<compile_context>
chip_gen: v7x
topology: tpu7x:2x2x1
jax: 0.10.0
libtpu: 0.0.40
codegen_flags: <defaults>
</compile_context>

<pallas_src>
import math

import jax
import jax.numpy as jnp
from jax import lax
from jax.experimental import pallas as pl
from jax.experimental.pallas import tpu as pltpu


def _round_up(x, m):
    return ((x + m - 1) // m) * m


def _make_convnorm_kernel(k, w_img, pad, write_act, write_short):
    """Kernel factory: writes only the requested outputs."""

    def kernel(x_main_ref, x_halo_ref, w_ref, shift_ref, *out_refs):
        # x_main_ref : (Cin, T)             flat padded-image window (lane axis = flat H*W)
        # x_halo_ref : (Cin, Hb)            the Hb elements following the main block
        # w_ref      : (K*K, Cout_pad, Cin) BN-scale-folded conv weights
        # shift_ref  : (Cout_pad, 1)        folded BN shift (f32)
        # out_refs   : (Cout_pad, T)        activation and/or shortcut tiles
        tile = x_main_ref.shape[-1]
        cout_p = w_ref.shape[1]

        # All K*K shifted views live inside [main | halo]; build it once in VMEM.
        xw = jnp.concatenate([x_main_ref[...], x_halo_ref[...]], axis=-1)  # (Cin, T+Hb)

        # Output column (x coordinate) of every lane; used to mask horizontal padding.
        col = (pl.program_id(1) * tile
               + lax.broadcasted_iota(jnp.int32, (1, tile), 1)) % w_img

        acc = jnp.zeros((cout_p, tile), jnp.float32)
        for di in range(k):
            for dj in range(k):
                off = di * w_img + dj            # flat shift of this conv tap
                win = xw[:, off:off + tile]      # (Cin, T)
                if dj != pad:                    # horizontal 'same'-padding mask
                    valid = (col >= pad - dj) & (col < w_img + pad - dj)
                    win = jnp.where(valid, win, jnp.zeros_like(win))
                acc = acc + jnp.dot(w_ref[di * k + dj], win,
                                    preferred_element_type=jnp.float32)

        y = acc + shift_ref[...]                 # (Cout_pad, 1) lane-broadcast, f32 epilogue
        i = 0
        if write_act:
            act = jnp.where(y >= 0.0, y, jnp.float32(0.01) * y)  # LeakyReLU(0.01)
            out_refs[i][...] = act.astype(out_refs[i].dtype)
            i += 1
        if write_short:
            out_refs[i][...] = y.astype(out_refs[i].dtype)

    return kernel


def conv_norm_forward(
    x_nchw,
    conv_weight_oihw,
    bn_gamma,
    bn_beta,
    bn_running_mean,
    bn_running_var,
    *,
    eps=1e-3,
    return_shortcut=False,
    skip_activation=False,
    compute_dtype=jnp.bfloat16,
    hw_tile_cap=8192,
):
    """Forward pass matching ConvNorm.forward (PyTorch NCHW in / NCHW out, eval-mode BN)."""
    n, cin, h, w_img = x_nchw.shape
    cout, cin_w, kh, kw = conv_weight_oihw.shape
    assert cin == cin_w and kh == kw
    k = kh
    assert k % 2 == 1, "ConvNorm 'same' padding assumes an odd kernel size"
    pad = (k - 1) // 2
    hw = h * w_img
    kk = k * k

    out_dtype = x_nchw.dtype
    in_bytes = jnp.dtype(compute_dtype).itemsize
    out_bytes = jnp.dtype(out_dtype).itemsize

    write_act = return_shortcut or not skip_activation
    write_short = return_shortcut or skip_activation
    n_out = int(write_act) + int(write_short)

    # Sublane multiples (8 for f32, 16 for bf16); pad Cout so stores are full vst.
    sub_in = 32 // in_bytes
    sub_out = 32 // out_bytes
    cout_pad = _round_up(cout, sub_out)
    cin_sub = _round_up(cin, sub_in)

    # Flat-shift geometry: tap (di, dj) reads flat offset di*W + dj within the window.
    halo = 2 * pad * (w_img + 1)             # largest tap offset
    hb = _round_up(max(halo, 1), 128)        # halo block width (lane multiple, divides tile)

    # ---- generation-aware VMEM sizing ----
    try:
        info = pltpu.get_tpu_info()
        vmem_cap = int(getattr(info, "vmem_capacity_bytes", 0)) or (64 << 20)
    except Exception:
        vmem_cap = 64 << 20                  # conservative (v7x per-TC) fallback
    vmem_limit = min(max(int(vmem_cap * 0.7), 32 << 20), vmem_cap - (8 << 20))
    budget = vmem_limit - (2 << 20)          # Mosaic internal-scratch headroom

    def _vmem_bytes(tile):
        inp = 2 * cin_sub * (tile + hb) * in_bytes        # main + halo blocks, double-buffered
        work = 2 * cin_sub * (tile + hb) * in_bytes       # concatenated window + masked temp
        outp = n_out * 2 * cout_pad * tile * out_bytes    # output block(s), double-buffered
        accb = 2 * cout_pad * tile * 4                    # f32 accumulator + epilogue temp
        wgt = 2 * (kk * _round_up(cout_pad, sub_in) * _round_up(cin, 128) * in_bytes
                   + cout_pad * 128 * 4)                  # weights + shift (assume 2 bufs)
        return inp + work + outp + accb + wgt

    # ---- pick HW tile: largest multiple of hb under the cap and the VMEM budget ----
    t = _round_up(hw, hb)
    t = min(t, max(hb, (int(hw_tile_cap) // hb) * hb))
    while t > hb and _vmem_bytes(t) > budget:
        t -= hb
    t = max(t, hb)
    nt = -(-hw // t)
    if n * nt < 2 and hw > hb:
        # Split the HW axis so both v7x TensorCores (megacore) get work.
        t = max(hb, _round_up((hw + 1) // 2, hb))
        nt = -(-hw // t)
    ratio = t // hb
    le = (nt + 1) * t                        # flat length incl. front offset + halo tail

    # ---- glue: ONE pad+cast pass (no K^2 replication in HBM) ----
    front = pad * w_img + pad                # so tap (di, dj) reads tile_start + di*W + dj
    back = le - front - hw
    x_flat = x_nchw.reshape(n, cin, hw).astype(compute_dtype)
    xe = jnp.pad(x_flat, ((0, 0), (0, 0), (front, back)))

    # ---- fold BatchNorm (eval mode): scale into weights, keep shift as bias ----
    scale = bn_gamma.astype(jnp.float32) / jnp.sqrt(
        bn_running_var.astype(jnp.float32) + eps)
    shift = bn_beta.astype(jnp.float32) - bn_running_mean.astype(jnp.float32) * scale
    # OIHW -> (K*K, Cout_pad, Cin); tap flat index = di*K + dj (matches kernel loop).
    w_taps = jnp.transpose(conv_weight_oihw, (2, 3, 0, 1)).reshape(kk, cout, cin)
    w_folded = w_taps.astype(jnp.float32) * scale[None, :, None]
    w_folded = jnp.pad(w_folded, ((0, 0), (0, cout_pad - cout), (0, 0))).astype(compute_dtype)
    shift2d = jnp.pad(shift.reshape(cout, 1), ((0, cout_pad - cout), (0, 0)))

    out_shape = tuple(
        jax.ShapeDtypeStruct((n, cout_pad, nt * t), out_dtype) for _ in range(n_out)
    )
    kernel = _make_convnorm_kernel(k, w_img, pad, write_act, write_short)

    def _call(single_buffer_consts):
        # Weight / shift block indices never change -> request a single VMEM buffer for
        # them (frees VMEM for a bigger HW tile, most useful on v7x's 64 MiB).
        const_mode = ({"pipeline_mode": pl.Buffered(1)} if single_buffer_consts else {})
        in_specs = [
            pl.BlockSpec((pl.Squeezed(), cin, t), lambda b, ti: (b, 0, ti)),
            pl.BlockSpec((pl.Squeezed(), cin, hb),
                         lambda b, ti: (b, 0, (ti + 1) * ratio)),
            pl.BlockSpec((kk, cout_pad, cin), lambda b, ti: (0, 0, 0), **const_mode),
            pl.BlockSpec((cout_pad, 1), lambda b, ti: (0, 0), **const_mode),
        ]
        out_specs = [
            pl.BlockSpec((pl.Squeezed(), cout_pad, t), lambda b, ti: (b, 0, ti))
            for _ in range(n_out)
        ]
        return pl.pallas_call(
            kernel,
            out_shape=out_shape,
            grid_spec=pltpu.PrefetchScalarGridSpec(
                num_scalar_prefetch=0,
                grid=(n, nt),
                in_specs=in_specs,
                out_specs=out_specs,
            ),
            compiler_params=pltpu.CompilerParams(
                dimension_semantics=("parallel", "parallel"),
                vmem_limit_bytes=int(vmem_limit),
            ),
        )(xe, xe, w_folded, shift2d)

    try:
        outs = _call(True)
    except Exception:
        # TODO(synk): pl.Buffered(1) single-buffering of constant operands unsupported on
        # this JAX version; fall back to default double buffering of weight/shift.
        outs = _call(False)

    if not isinstance(outs, (tuple, list)):
        outs = (outs,)

    def _to_nchw(o):
        return o[:, :cout, :hw].reshape(n, cout, h, w_img)

    outs = tuple(_to_nchw(o) for o in outs)

    if return_shortcut:
        act, shortcut = outs
        return act, shortcut
    elif skip_activation:
        (shortcut,) = outs
        return shortcut
    else:
        (act,) = outs
        return act


if __name__ == "__main__":
    # Small shapes consistent with the module: NCHW input.
    N, CIN, COUT, H, W, K = 2, 4, 8, 16, 16, 3
    EPS = 1e-3

    key = jax.random.PRNGKey(0)
    k1, k2, k3, k4, k5, k6 = jax.random.split(key, 6)

    x = jax.random.normal(k1, (N, CIN, H, W), jnp.float32)

    # Deterministic parameter init (shapes from nn.Conv2d / nn.BatchNorm2d).
    fan_in = CIN * K * K
    bound = 1.0 / math.sqrt(fan_in)
    conv_w = jax.random.uniform(k2, (COUT, CIN, K, K), jnp.float32, -bound, bound)
    bn_gamma = jax.random.uniform(k3, (COUT,), jnp.float32, 0.5, 1.5)
    bn_beta = 0.1 * jax.random.normal(k4, (COUT,), jnp.float32)
    bn_mean = 0.1 * jax.random.normal(k5, (COUT,), jnp.float32)
    bn_var = jax.random.uniform(k6, (COUT,), jnp.float32, 0.5, 1.5)

    act, shortcut = conv_norm_forward(
        x, conv_w, bn_gamma, bn_beta, bn_mean, bn_var, eps=EPS, return_shortcut=True
    )
    act_only = conv_norm_forward(x, conv_w, bn_gamma, bn_beta, bn_mean, bn_var, eps=EPS)
    short_only = conv_norm_forward(
        x, conv_w, bn_gamma, bn_beta, bn_mean, bn_var, eps=EPS, skip_activation=True
    )
    # f32 compute path for tighter parity with the f32 PyTorch conv.
    act32, short32 = conv_norm_forward(
        x, conv_w, bn_gamma, bn_beta, bn_mean, bn_var, eps=EPS,
        return_shortcut=True, compute_dtype=jnp.float32,
    )
    jax.block_until_ready((act, shortcut, act_only, short_only, act32, short32))

    # Pure-JAX reference for sanity.
    w_hwio = jnp.transpose(conv_w, (2, 3, 1, 0))
    x_nhwc = jnp.transpose(x, (0, 2, 3, 1))
    ref_conv = lax.conv_general_dilated(
        x_nhwc, w_hwio, window_strides=(1, 1),
        padding=((1, 1), (1, 1)),
        dimension_numbers=("NHWC", "HWIO", "NHWC"),
        precision=lax.Precision.HIGHEST,
    )
    scale = bn_gamma / jnp.sqrt(bn_var + EPS)
    shift = bn_beta - bn_mean * scale
    ref_short = ref_conv * scale + shift
    ref_act = jnp.where(ref_short >= 0, ref_short, 0.01 * ref_short)
    ref_short = jnp.transpose(ref_short, (0, 3, 1, 2))
    ref_act = jnp.transpose(ref_act, (0, 3, 1, 2))

    assert act.shape == (N, COUT, H, W) and shortcut.shape == (N, COUT, H, W)
    # bf16 compute path (inference default) — loose tolerance.
    assert jnp.allclose(shortcut, ref_short, rtol=5e-2, atol=5e-2)
    assert jnp.allclose(act, ref_act, rtol=5e-2, atol=5e-2)
    assert jnp.allclose(act_only, ref_act, rtol=5e-2, atol=5e-2)
    assert jnp.allclose(short_only, ref_short, rtol=5e-2, atol=5e-2)
    # f32 compute path — tight parity.
    assert jnp.allclose(short32, ref_short, rtol=2e-3, atol=2e-3)
    assert jnp.allclose(act32, ref_act, rtol=2e-3, atol=2e-3)

    print("KERNEL_OK")
</pallas_src>

<mosaic_0001>
module attributes {stable_mosaic.version = 11 : i64} {
  func.func @kernel(%arg0: i32, %arg1: i32, %arg2: memref<1x4x256xbf16, #tpu.memory_space<vmem>>, %arg3: memref<1x4x128xbf16, #tpu.memory_space<vmem>>, %arg4: memref<9x8x4xbf16, #tpu.memory_space<vmem>>, %arg5: memref<8x1xf32, #tpu.memory_space<vmem>>, %arg6: memref<1x8x256xf32, #tpu.memory_space<vmem>>, %arg7: memref<1x8x256xf32, #tpu.memory_space<vmem>>) attributes {dimension_semantics = [#tpu.dimension_semantics<parallel>, #tpu.dimension_semantics<parallel>], iteration_bounds = array<i64: 2, 1>, scalar_prefetch = 0 : i64, scratch_operands = 0 : i64, tpu.core_type = #tpu.core_type<tc>, window_params = [{transform_indices = @transform_0, window_bounds = array<i64: 1, 4, 256>}, {transform_indices = @transform_1, window_bounds = array<i64: 1, 4, 128>}, {pipeline_mode = #tpu.pipeline_mode<synchronous>, transform_indices = @transform_2, window_bounds = array<i64: 9, 8, 4>}, {pipeline_mode = #tpu.pipeline_mode<synchronous>, transform_indices = @transform_3, window_bounds = array<i64: 8, 1>}, {transform_indices = @transform_4, window_bounds = array<i64: 1, 8, 256>}, {transform_indices = @transform_5, window_bounds = array<i64: 1, 8, 256>}]} {
    %c0 = arith.constant 0 : index
    %c0_0 = arith.constant 0 : index
    %c0_1 = arith.constant 0 : index
    %0 = vector.load %arg2[%c0, %c0_0, %c0_1] : memref<1x4x256xbf16, #tpu.memory_space<vmem>>, vector<1x4x256xbf16>
    %1 = vector.shape_cast %0 : vector<1x4x256xbf16> to vector<4x256xbf16>
    %c0_2 = arith.constant 0 : index
    %c0_3 = arith.constant 0 : index
    %c0_4 = arith.constant 0 : index
    %2 = vector.load %arg3[%c0_2, %c0_3, %c0_4] : memref<1x4x128xbf16, #tpu.memory_space<vmem>>, vector<1x4x128xbf16>
    %3 = vector.shape_cast %2 : vector<1x4x128xbf16> to vector<4x128xbf16>
    %4 = tpu.concatenate %1, %3 in 1 : vector<4x256xbf16>, vector<4x128xbf16> -> vector<4x384xbf16>
    %c256_i32 = arith.constant 256 : i32
    %5 = arith.muli %arg1, %c256_i32 : i32
    %6 = tpu.iota {dimensions = array<i32: 1>} : vector<1x256xi32>
    %7 = vector.broadcast %5 : i32 to vector<1x256xi32>
    %8 = arith.addi %7, %6 : vector<1x256xi32>
    %c16_i32 = arith.constant 16 : i32
    %c0_i32 = arith.constant 0 : i32
    %9 = arith.cmpi eq, %c16_i32, %c0_i32 : i32
    %c1_i32 = arith.constant 1 : i32
    %10 = arith.select %9, %c1_i32, %c16_i32 : i32
    %11 = vector.broadcast %10 : i32 to vector<1x256xi32>
    %12 = arith.remsi %8, %11 : vector<1x256xi32>
    %c0_i32_5 = arith.constant 0 : i32
    %13 = vector.broadcast %c0_i32_5 : i32 to vector<1x256xi32>
    %14 = arith.cmpi ne, %12, %13 : vector<1x256xi32>
    %c0_i32_6 = arith.constant 0 : i32
    %15 = vector.broadcast %c0_i32_6 : i32 to vector<1x256xi32>
    %16 = arith.cmpi slt, %12, %15 : vector<1x256xi32>
    %c0_i32_7 = arith.constant 0 : i32
    %17 = arith.cmpi slt, %10, %c0_i32_7 : i32
    %18 = vector.broadcast %17 : i1 to vector<1x256xi1>
    %19 = vector.broadcast %18 : vector<1x256xi1> to vector<1x256xi1>
    %20 = arith.xori %16, %19 : vector<1x256xi1>
    %21 = arith.andi %20, %14 : vector<1x256xi1>
    %22 = vector.broadcast %10 : i32 to vector<1x256xi32>
    %23 = arith.addi %12, %22 : vector<1x256xi32>
    %24 = arith.select %21, %23, %12 : vector<1x256xi1>, vector<1x256xi32>
    %cst = arith.constant 0.000000e+00 : f32
    %25 = vector.broadcast %cst : f32 to vector<8x256xf32>
    %26 = vector.extract_strided_slice %4 {offsets = [0, 0], sizes = [4, 256], strides = [1, 1]} : vector<4x384xbf16> to vector<4x256xbf16>
    %c1_i32_8 = arith.constant 1 : i32
    %27 = vector.broadcast %c1_i32_8 : i32 to vector<1x256xi32>
    %28 = arith.cmpi sge, %24, %27 : vector<1x256xi32>
    %c17_i32 = arith.constant 17 : i32
    %29 = vector.broadcast %c17_i32 : i32 to vector<1x256xi32>
    %30 = arith.cmpi slt, %24, %29 : vector<1x256xi32>
    %31 = arith.andi %28, %30 : vector<1x256xi1>
    %cst_9 = arith.constant 0.000000e+00 : bf16
    %32 = vector.broadcast %cst_9 : bf16 to vector<4x256xbf16>
    %33 = vector.shape_cast %31 : vector<1x256xi1> to vector<1x256xi1>
    %34 = vector.broadcast %33 : vector<1x256xi1> to vector<4x256xi1>
    %35 = arith.select %34, %26, %32 : vector<4x256xi1>, vector<4x256xbf16>
    %c0_10 = arith.constant 0 : index
    %c0_11 = arith.constant 0 : index
    %c0_12 = arith.constant 0 : index
    %36 = vector.load %arg4[%c0_10, %c0_11, %c0_12] : memref<9x8x4xbf16, #tpu.memory_space<vmem>>, vector<1x8x4xbf16>
    %37 = vector.shape_cast %36 : vector<1x8x4xbf16> to vector<8x4xbf16>
    %cst_13 = arith.constant dense<0.000000e+00> : vector<8x256xf32>
    %38 = tpu.matmul %37, %35, %cst_13 {dimension_numbers = #tpu.dot_dimension_numbers<[1], [0], [0], [1], [0, 0, 1, 1], [], []>} : vector<8x4xbf16>, vector<4x256xbf16>, vector<8x256xf32> -> vector<8x256xf32>
    %39 = arith.addf %25, %38 : vector<8x256xf32>
    %40 = vector.extract_strided_slice %4 {offsets = [0, 1], sizes = [4, 256], strides = [1, 1]} : vector<4x384xbf16> to vector<4x256xbf16>
    %c1 = arith.constant 1 : index
    %c0_14 = arith.constant 0 : index
    %c0_15 = arith.constant 0 : index
    %41 = vector.load %arg4[%c1, %c0_14, %c0_15] : memref<9x8x4xbf16, #tpu.memory_space<vmem>>, vector<1x8x4xbf16>
    %42 = vector.shape_cast %41 : vector<1x8x4xbf16> to vector<8x4xbf16>
    %cst_16 = arith.constant dense<0.000000e+00> : vector<8x256xf32>
    %43 = tpu.matmul %42, %40, %cst_16 {dimension_numbers = #tpu.dot_dimension_numbers<[1], [0], [0], [1], [0, 0, 1, 1], [], []>} : vector<8x4xbf16>, vector<4x256xbf16>, vector<8x256xf32> -> vector<8x256xf32>
    %44 = arith.addf %39, %43 : vector<8x256xf32>
    %45 = vector.extract_strided_slice %4 {offsets = [0, 2], sizes = [4, 256], strides = [1, 1]} : vector<4x384xbf16> to vector<4x256xbf16>
    %c-1_i32 = arith.constant -1 : i32
    %46 = vector.broadcast %c-1_i32 : i32 to vector<1x256xi32>
    %47 = arith.cmpi sge, %24, %46 : vector<1x256xi32>
    %c15_i32 = arith.constant 15 : i32
    %48 = vector.broadcast %c15_i32 : i32 to vector<1x256xi32>
    %49 = arith.cmpi slt, %24, %48 : vector<1x256xi32>
    %50 = arith.andi %47, %49 : vector<1x256xi1>
    %cst_17 = arith.constant 0.000000e+00 : bf16
    %51 = vector.broadcast %cst_17 : bf16 to vector<4x256xbf16>
    %52 = vector.shape_cast %50 : vector<1x256xi1> to vector<1x256xi1>
    %53 = vector.broadcast %52 : vector<1x256xi1> to vector<4x256xi1>
    %54 = arith.select %53, %45, %51 : vector<4x256xi1>, vector<4x256xbf16>
    %c2 = arith.constant 2 : index
    %c0_18 = arith.constant 0 : index
    %c0_19 = arith.constant 0 : index
    %55 = vector.load %arg4[%c2, %c0_18, %c0_19] : memref<9x8x4xbf16, #tpu.memory_space<vmem>>, vector<1x8x4xbf16>
    %56 = vector.shape_cast %55 : vector<1x8x4xbf16> to vector<8x4xbf16>
    %cst_20 = arith.constant dense<0.000000e+00> : vector<8x256xf32>
    %57 = tpu.matmul %56, %54, %cst_20 {dimension_numbers = #tpu.dot_dimension_numbers<[1], [0], [0], [1], [0, 0, 1, 1], [], []>} : vector<8x4xbf16>, vector<4x256xbf16>, vector<8x256xf32> -> vector<8x256xf32>
    %58 = arith.addf %44, %57 : vector<8x256xf32>
    %59 = vector.extract_strided_slice %4 {offsets = [0, 16], sizes = [4, 256], strides = [1, 1]} : vector<4x384xbf16> to vector<4x256xbf16>
    %c1_i32_21 = arith.constant 1 : i32
    %60 = vector.broadcast %c1_i32_21 : i32 to vector<1x256xi32>
    %61 = arith.cmpi sge, %24, %60 : vector<1x256xi32>
    %c17_i32_22 = arith.constant 17 : i32
    %62 = vector.broadcast %c17_i32_22 : i32 to vector<1x256xi32>
    %63 = arith.cmpi slt, %24, %62 : vector<1x256xi32>
    %64 = arith.andi %61, %63 : vector<1x256xi1>
    %cst_23 = arith.constant 0.000000e+00 : bf16
    %65 = vector.broadcast %cst_23 : bf16 to vector<4x256xbf16>
    %66 = vector.shape_cast %64 : vector<1x256xi1> to vector<1x256xi1>
    %67 = vector.broadcast %66 : vector<1x256xi1> to vector<4x256xi1>
    %68 = arith.select %67, %59, %65 : vector<4x256xi1>, vector<4x256xbf16>
    %c3 = arith.constant 3 : index
    %c0_24 = arith.constant 0 : index
    %c0_25 = arith.constant 0 : index
    %69 = vector.load %arg4[%c3, %c0_24, %c0_25] : memref<9x8x4xbf16, #tpu.memory_space<vmem>>, vector<1x8x4xbf16>
    %70 = vector.shape_cast %69 : vector<1x8x4xbf16> to vector<8x4xbf16>
    %cst_26 = arith.constant dense<0.000000e+00> : vector<8x256xf32>
    %71 = tpu.matmul %70, %68, %cst_26 {dimension_numbers = #tpu.dot_dimension_numbers<[1], [0], [0], [1], [0, 0, 1, 1], [], []>} : vector<8x4xbf16>, vector<4x256xbf16>, vector<8x256xf32> -> vector<8x256xf32>
    %72 = arith.addf %58, %71 : vector<8x256xf32>
    %73 = vector.extract_strided_slice %4 {offsets = [0, 17], sizes = [4, 256], strides = [1, 1]} : vector<4x384xbf16> to vector<4x256xbf16>
    %c4 = arith.constant 4 : index
    %c0_27 = arith.constant 0 : index
    %c0_28 = arith.constant 0 : index
    %74 = vector.load %arg4[%c4, %c0_27, %c0_28] : memref<9x8x4xbf16, #tpu.memory_space<vmem>>, vector<1x8x4xbf16>
    %75 = vector.shape_cast %74 : vector<1x8x4xbf16> to vector<8x4xbf16>
    %cst_29 = arith.constant dense<0.000000e+00> : vector<8x256xf32>
    %76 = tpu.matmul %75, %73, %cst_29 {dimension_numbers = #tpu.dot_dimension_numbers<[1], [0], [0], [1], [0, 0, 1, 1], [], []>} : vector<8x4xbf16>, vector<4x256xbf16>, vector<8x256xf32> -> vector<8x256xf32>
    %77 = arith.addf %72, %76 : vector<8x256xf32>
    %78 = vector.extract_strided_slice %4 {offsets = [0, 18], sizes = [4, 256], strides = [1, 1]} : vector<4x384xbf16> to vector<4x256xbf16>
    %c-1_i32_30 = arith.constant -1 : i32
    %79 = vector.broadcast %c-1_i32_30 : i32 to vector<1x256xi32>
    %80 = arith.cmpi sge, %24, %79 : vector<1x256xi32>
    %c15_i32_31 = arith.constant 15 : i32
    %81 = vector.broadcast %c15_i32_31 : i32 to vector<1x256xi32>
    %82 = arith.cmpi slt, %24, %81 : vector<1x256xi32>
    %83 = arith.andi %80, %82 : vector<1x256xi1>
    %cst_32 = arith.constant 0.000000e+00 : bf16
    %84 = vector.broadcast %cst_32 : bf16 to vector<4x256xbf16>
    %85 = vector.shape_cast %83 : vector<1x256xi1> to vector<1x256xi1>
    %86 = vector.broadcast %85 : vector<1x256xi1> to vector<4x256xi1>
    %87 = arith.select %86, %78, %84 : vector<4x256xi1>, vector<4x256xbf16>
    %c5 = arith.constant 5 : index
    %c0_33 = arith.constant 0 : index
    %c0_34 = arith.constant 0 : index
    %88 = vector.load %arg4[%c5, %c0_33, %c0_34] : memref<9x8x4xbf16, #tpu.memory_space<vmem>>, vector<1x8x4xbf16>
    %89 = vector.shape_cast %88 : vector<1x8x4xbf16> to vector<8x4xbf16>
    %cst_35 = arith.constant dense<0.000000e+00> : vector<8x256xf32>
    %90 = tpu.matmul %89, %87, %cst_35 {dimension_numbers = #tpu.dot_dimension_numbers<[1], [0], [0], [1], [0, 0, 1, 1], [], []>} : vector<8x4xbf16>, vector<4x256xbf16>, vector<8x256xf32> -> vector<8x256xf32>
    %91 = arith.addf %77, %90 : vector<8x256xf32>
    %92 = vector.extract_strided_slice %4 {offsets = [0, 32], sizes = [4, 256], strides = [1, 1]} : vector<4x384xbf16> to vector<4x256xbf16>
    %c1_i32_36 = arith.constant 1 : i32
    %93 = vector.broadcast %c1_i32_36 : i32 to vector<1x256xi32>
    %94 = arith.cmpi sge, %24, %93 : vector<1x256xi32>
    %c17_i32_37 = arith.constant 17 : i32
    %95 = vector.broadcast %c17_i32_37 : i32 to vector<1x256xi32>
    %96 = arith.cmpi slt, %24, %95 : vector<1x256xi32>
    %97 = arith.andi %94, %96 : vector<1x256xi1>
    %cst_38 = arith.constant 0.000000e+00 : bf16
    %98 = vector.broadcast %cst_38 : bf16 to vector<4x256xbf16>
    %99 = vector.shape_cast %97 : vector<1x256xi1> to vector<1x256xi1>
    %100 = vector.broadcast %99 : vector<1x256xi1> to vector<4x256xi1>
    %101 = arith.select %100, %92, %98 : vector<4x256xi1>, vector<4x256xbf16>
    %c6 = arith.constant 6 : index
    %c0_39 = arith.constant 0 : index
    %c0_40 = arith.constant 0 : index
    %102 = vector.load %arg4[%c6, %c0_39, %c0_40] : memref<9x8x4xbf16, #tpu.memory_space<vmem>>, vector<1x8x4xbf16>
    %103 = vector.shape_cast %102 : vector<1x8x4xbf16> to vector<8x4xbf16>
    %cst_41 = arith.constant dense<0.000000e+00> : vector<8x256xf32>
    %104 = tpu.matmul %103, %101, %cst_41 {dimension_numbers = #tpu.dot_dimension_numbers<[1], [0], [0], [1], [0, 0, 1, 1], [], []>} : vector<8x4xbf16>, vector<4x256xbf16>, vector<8x256xf32> -> vector<8x256xf32>
    %105 = arith.addf %91, %104 : vector<8x256xf32>
    %106 = vector.extract_strided_slice %4 {offsets = [0, 33], sizes = [4, 256], strides = [1, 1]} : vector<4x384xbf16> to vector<4x256xbf16>
    %c7 = arith.constant 7 : index
    %c0_42 = arith.constant 0 : index
    %c0_43 = arith.constant 0 : index
    %107 = vector.load %arg4[%c7, %c0_42, %c0_43] : memref<9x8x4xbf16, #tpu.memory_space<vmem>>, vector<1x8x4xbf16>
    %108 = vector.shape_cast %107 : vector<1x8x4xbf16> to vector<8x4xbf16>
    %cst_44 = arith.constant dense<0.000000e+00> : vector<8x256xf32>
    %109 = tpu.matmul %108, %106, %cst_44 {dimension_numbers = #tpu.dot_dimension_numbers<[1], [0], [0], [1], [0, 0, 1, 1], [], []>} : vector<8x4xbf16>, vector<4x256xbf16>, vector<8x256xf32> -> vector<8x256xf32>
    %110 = arith.addf %105, %109 : vector<8x256xf32>
    %111 = vector.extract_strided_slice %4 {offsets = [0, 34], sizes = [4, 256], strides = [1, 1]} : vector<4x384xbf16> to vector<4x256xbf16>
    %c-1_i32_45 = arith.constant -1 : i32
    %112 = vector.broadcast %c-1_i32_45 : i32 to vector<1x256xi32>
    %113 = arith.cmpi sge, %24, %112 : vector<1x256xi32>
    %c15_i32_46 = arith.constant 15 : i32
    %114 = vector.broadcast %c15_i32_46 : i32 to vector<1x256xi32>
    %115 = arith.cmpi slt, %24, %114 : vector<1x256xi32>
    %116 = arith.andi %113, %115 : vector<1x256xi1>
    %cst_47 = arith.constant 0.000000e+00 : bf16
    %117 = vector.broadcast %cst_47 : bf16 to vector<4x256xbf16>
    %118 = vector.shape_cast %116 : vector<1x256xi1> to vector<1x256xi1>
    %119 = vector.broadcast %118 : vector<1x256xi1> to vector<4x256xi1>
    %120 = arith.select %119, %111, %117 : vector<4x256xi1>, vector<4x256xbf16>
    %c8 = arith.constant 8 : index
    %c0_48 = arith.constant 0 : index
    %c0_49 = arith.constant 0 : index
    %121 = vector.load %arg4[%c8, %c0_48, %c0_49] : memref<9x8x4xbf16, #tpu.memory_space<vmem>>, vector<1x8x4xbf16>
    %122 = vector.shape_cast %121 : vector<1x8x4xbf16> to vector<8x4xbf16>
    %cst_50 = arith.constant dense<0.000000e+00> : vector<8x256xf32>
    %123 = tpu.matmul %122, %120, %cst_50 {dimension_numbers = #tpu.dot_dimension_numbers<[1], [0], [0], [1], [0, 0, 1, 1], [], []>} : vector<8x4xbf16>, vector<4x256xbf16>, vector<8x256xf32> -> vector<8x256xf32>
    %124 = arith.addf %110, %123 : vector<8x256xf32>
    %c0_51 = arith.constant 0 : index
    %c0_52 = arith.constant 0 : index
    %125 = vector.load %arg5[%c0_51, %c0_52] : memref<8x1xf32, #tpu.memory_space<vmem>>, vector<8x1xf32>
    %126 = vector.broadcast %125 : vector<8x1xf32> to vector<8x256xf32>
    %127 = arith.addf %124, %126 : vector<8x256xf32>
    %cst_53 = arith.constant 0.000000e+00 : f32
    %128 = vector.broadcast %cst_53 : f32 to vector<8x256xf32>
    %129 = arith.cmpf oge, %127, %128 : vector<8x256xf32>
    %cst_54 = arith.constant 0.00999999977 : f32
    %130 = vector.broadcast %cst_54 : f32 to vector<8x256xf32>
    %131 = arith.mulf %130, %127 : vector<8x256xf32>
    %132 = arith.select %129, %127, %131 : vector<8x256xi1>, vector<8x256xf32>
    %c0_55 = arith.constant 0 : index
    %c0_56 = arith.constant 0 : index
    %c0_57 = arith.constant 0 : index
    %133 = vector.load %arg6[%c0_55, %c0_56, %c0_57] : memref<1x8x256xf32, #tpu.memory_space<vmem>>, vector<1x8x256xf32>
    %134 = vector.shape_cast %133 : vector<1x8x256xf32> to vector<8x256xf32>
    %135 = vector.shape_cast %132 : vector<8x256xf32> to vector<1x8x256xf32>
    tpu.vector_store %arg6[%c0_55, %c0_56, %c0_57], %135 {strides = array<i32>} : memref<1x8x256xf32, #tpu.memory_space<vmem>>, vector<1x8x256xf32>,
    %c0_58 = arith.constant 0 : index
    %c0_59 = arith.constant 0 : index
    %c0_60 = arith.constant 0 : index
    %136 = vector.load %arg7[%c0_58, %c0_59, %c0_60] : memref<1x8x256xf32, #tpu.memory_space<vmem>>, vector<1x8x256xf32>
    %137 = vector.shape_cast %136 : vector<1x8x256xf32> to vector<8x256xf32>
    %138 = vector.shape_cast %127 : vector<8x256xf32> to vector<1x8x256xf32>
    tpu.vector_store %arg7[%c0_58, %c0_59, %c0_60], %138 {strides = array<i32>} : memref<1x8x256xf32, #tpu.memory_space<vmem>>, vector<1x8x256xf32>,
    return
  }
  func.func @transform_0(%arg0: i32, %arg1: i32) -> (i32, i32, i32) {
    %c0_i32 = arith.constant 0 : i32
    %c0_i32_0 = arith.constant 0 : i32
    return %arg0, %c0_i32, %arg1 : i32, i32, i32
  }
  func.func @transform_1(%arg0: i32, %arg1: i32) -> (i32, i32, i32) {
    %c1_i32 = arith.constant 1 : i32
    %0 = arith.addi %arg1, %c1_i32 : i32
    %c2_i32 = arith.constant 2 : i32
    %1 = arith.muli %0, %c2_i32 : i32
    %c0_i32 = arith.constant 0 : i32
    %c0_i32_0 = arith.constant 0 : i32
    return %arg0, %c0_i32, %1 : i32, i32, i32
  }
  func.func @transform_2(%arg0: i32, %arg1: i32) -> (i32, i32, i32) {
    %c0_i32 = arith.constant 0 : i32
    %c0_i32_0 = arith.constant 0 : i32
    %c0_i32_1 = arith.constant 0 : i32
    %c0_i32_2 = arith.constant 0 : i32
    return %c0_i32, %c0_i32_0, %c0_i32_1 : i32, i32, i32
  }
  func.func @transform_3(%arg0: i32, %arg1: i32) -> (i32, i32) {
    %c0_i32 = arith.constant 0 : i32
    %c0_i32_0 = arith.constant 0 : i32
    %c0_i32_1 = arith.constant 0 : i32
    return %c0_i32, %c0_i32_0 : i32, i32
  }
  func.func @transform_4(%arg0: i32, %arg1: i32) -> (i32, i32, i32) {
    %c0_i32 = arith.constant 0 : i32
    %c0_i32_0 = arith.constant 0 : i32
    return %arg0, %c0_i32, %arg1 : i32, i32, i32
  }
  func.func @transform_5(%arg0: i32, %arg1: i32) -> (i32, i32, i32) {
    %c0_i32 = arith.constant 0 : i32
    %c0_i32_0 = arith.constant 0 : i32
    return %arg0, %c0_i32, %arg1 : i32, i32, i32
  }
}

module attributes {stable_mosaic.version = 11 : i64} {
  func.func @kernel(%arg0: i32, %arg1: i32, %arg2: memref<1x4x256xbf16, #tpu.memory_space<vmem>>, %arg3: memref<1x4x128xbf16, #tpu.memory_space<vmem>>, %arg4: memref<9x8x4xbf16, #tpu.memory_space<vmem>>, %arg5: memref<8x1xf32, #tpu.memory_space<vmem>>, %arg6: memref<1x8x256xf32, #tpu.memory_space<vmem>>, %arg7: memref<1x8x256xf32, #tpu.memory_space<vmem>>) attributes {dimension_semantics = [#tpu.dimension_semantics<parallel>, #tpu.dimension_semantics<parallel>], iteration_bounds = array<i64: 2, 1>, scalar_prefetch = 0 : i64, scratch_operands = 0 : i64, tpu.core_type = #tpu.core_type<tc>, window_params = [{transform_indices = @transform_0, window_bounds = array<i64: 1, 4, 256>}, {transform_indices = @transform_1, window_bounds = array<i64: 1, 4, 128>}, {pipeline_mode = #tpu.pipeline_mode<synchronous>, transform_indices = @transform_2, window_bounds = array<i64: 9, 8, 4>}, {pipeline_mode = #tpu.pipeline_mode<synchronous>, transform_indices = @transform_3, window_bounds = array<i64: 8, 1>}, {transform_indices = @transform_4, window_bounds = array<i64: 1, 8, 256>}, {transform_indices = @transform_5, window_bounds = array<i64: 1, 8, 256>}]} {
    %c0 = arith.constant 0 : index
    %c0_0 = arith.constant 0 : index
    %c0_1 = arith.constant 0 : index
    %0 = vector.load %arg2[%c0, %c0_0, %c0_1] : memref<1x4x256xbf16, #tpu.memory_space<vmem>>, vector<1x4x256xbf16>
    %1 = vector.shape_cast %0 : vector<1x4x256xbf16> to vector<4x256xbf16>
    %c0_2 = arith.constant 0 : index
    %c0_3 = arith.constant 0 : index
    %c0_4 = arith.constant 0 : index
    %2 = vector.load %arg3[%c0_2, %c0_3, %c0_4] : memref<1x4x128xbf16, #tpu.memory_space<vmem>>, vector<1x4x128xbf16>
    %3 = vector.shape_cast %2 : vector<1x4x128xbf16> to vector<4x128xbf16>
    %4 = tpu.concatenate %1, %3 in 1 : vector<4x256xbf16>, vector<4x128xbf16> -> vector<4x384xbf16>
    %c256_i32 = arith.constant 256 : i32
    %5 = arith.muli %arg1, %c256_i32 : i32
    %6 = tpu.iota {dimensions = array<i32: 1>} : vector<1x256xi32>
    %7 = vector.broadcast %5 : i32 to vector<1x256xi32>
    %8 = arith.addi %7, %6 : vector<1x256xi32>
    %c16_i32 = arith.constant 16 : i32
    %c0_i32 = arith.constant 0 : i32
    %9 = arith.cmpi eq, %c16_i32, %c0_i32 : i32
    %c1_i32 = arith.constant 1 : i32
    %10 = arith.select %9, %c1_i32, %c16_i32 : i32
    %11 = vector.broadcast %10 : i32 to vector<1x256xi32>
    %12 = arith.remsi %8, %11 : vector<1x256xi32>
    %c0_i32_5 = arith.constant 0 : i32
    %13 = vector.broadcast %c0_i32_5 : i32 to vector<1x256xi32>
    %14 = arith.cmpi ne, %12, %13 : vector<1x256xi32>
    %c0_i32_6 = arith.constant 0 : i32
    %15 = vector.broadcast %c0_i32_6 : i32 to vector<1x256xi32>
    %16 = arith.cmpi slt, %12, %15 : vector<1x256xi32>
    %c0_i32_7 = arith.constant 0 : i32
    %17 = arith.cmpi slt, %10, %c0_i32_7 : i32
    %18 = vector.broadcast %17 : i1 to vector<1x256xi1>
    %19 = vector.broadcast %18 : vector<1x256xi1> to vector<1x256xi1>
    %20 = arith.xori %16, %19 : vector<1x256xi1>
    %21 = arith.andi %20, %14 : vector<1x256xi1>
    %22 = vector.broadcast %10 : i32 to vector<1x256xi32>
    %23 = arith.addi %12, %22 : vector<1x256xi32>
    %24 = arith.select %21, %23, %12 : vector<1x256xi1>, vector<1x256xi32>
    %cst = arith.constant 0.000000e+00 : f32
    %25 = vector.broadcast %cst : f32 to vector<8x256xf32>
    %26 = vector.extract_strided_slice %4 {offsets = [0, 0], sizes = [4, 256], strides = [1, 1]} : vector<4x384xbf16> to vector<4x256xbf16>
    %c1_i32_8 = arith.constant 1 : i32
    %27 = vector.broadcast %c1_i32_8 : i32 to vector<1x256xi32>
    %28 = arith.cmpi sge, %24, %27 : vector<1x256xi32>
    %c17_i32 = arith.constant 17 : i32
    %29 = vector.broadcast %c17_i32 : i32 to vector<1x256xi32>
    %30 = arith.cmpi slt, %24, %29 : vector<1x256xi32>
    %31 = arith.andi %28, %30 : vector<1x256xi1>
    %cst_9 = arith.constant 0.000000e+00 : bf16
    %32 = vector.broadcast %cst_9 : bf16 to vector<4x256xbf16>
    %33 = vector.shape_cast %31 : vector<1x256xi1> to vector<1x256xi1>
    %34 = vector.broadcast %33 : vector<1x256xi1> to vector<4x256xi1>
    %35 = arith.select %34, %26, %32 : vector<4x256xi1>, vector<4x256xbf16>
    %c0_10 = arith.constant 0 : index
    %c0_11 = arith.constant 0 : index
    %c0_12 = arith.constant 0 : index
    %36 = vector.load %arg4[%c0_10, %c0_11, %c0_12] : memref<9x8x4xbf16, #tpu.memory_space<vmem>>, vector<1x8x4xbf16>
    %37 = vector.shape_cast %36 : vector<1x8x4xbf16> to vector<8x4xbf16>
    %cst_13 = arith.constant dense<0.000000e+00> : vector<8x256xf32>
    %38 = tpu.matmul %37, %35, %cst_13 {dimension_numbers = #tpu.dot_dimension_numbers<[1], [0], [0], [1], [0, 0, 1, 1], [], []>} : vector<8x4xbf16>, vector<4x256xbf16>, vector<8x256xf32> -> vector<8x256xf32>
    %39 = arith.addf %25, %38 : vector<8x256xf32>
    %40 = vector.extract_strided_slice %4 {offsets = [0, 1], sizes = [4, 256], strides = [1, 1]} : vector<4x384xbf16> to vector<4x256xbf16>
    %c1 = arith.constant 1 : index
    %c0_14 = arith.constant 0 : index
    %c0_15 = arith.constant 0 : index
    %41 = vector.load %arg4[%c1, %c0_14, %c0_15] : memref<9x8x4xbf16, #tpu.memory_space<vmem>>, vector<1x8x4xbf16>
    %42 = vector.shape_cast %41 : vector<1x8x4xbf16> to vector<8x4xbf16>
    %cst_16 = arith.constant dense<0.000000e+00> : vector<8x256xf32>
    %43 = tpu.matmul %42, %40, %cst_16 {dimension_numbers = #tpu.dot_dimension_numbers<[1], [0], [0], [1], [0, 0, 1, 1], [], []>} : vector<8x4xbf16>, vector<4x256xbf16>, vector<8x256xf32> -> vector<8x256xf32>
    %44 = arith.addf %39, %43 : vector<8x256xf32>
    %45 = vector.extract_strided_slice %4 {offsets = [0, 2], sizes = [4, 256], strides = [1, 1]} : vector<4x384xbf16> to vector<4x256xbf16>
    %c-1_i32 = arith.constant -1 : i32
    %46 = vector.broadcast %c-1_i32 : i32 to vector<1x256xi32>
    %47 = arith.cmpi sge, %24, %46 : vector<1x256xi32>
    %c15_i32 = arith.constant 15 : i32
    %48 = vector.broadcast %c15_i32 : i32 to vector<1x256xi32>
    %49 = arith.cmpi slt, %24, %48 : vector<1x256xi32>
    %50 = arith.andi %47, %49 : vector<1x256xi1>
    %cst_17 = arith.constant 0.000000e+00 : bf16
    %51 = vector.broadcast %cst_17 : bf16 to vector<4x256xbf16>
    %52 = vector.shape_cast %50 : vector<1x256xi1> to vector<1x256xi1>
    %53 = vector.broadcast %52 : vector<1x256xi1> to vector<4x256xi1>
    %54 = arith.select %53, %45, %51 : vector<4x256xi1>, vector<4x256xbf16>
    %c2 = arith.constant 2 : index
    %c0_18 = arith.constant 0 : index
    %c0_19 = arith.constant 0 : index
    %55 = vector.load %arg4[%c2, %c0_18, %c0_19] : memref<9x8x4xbf16, #tpu.memory_space<vmem>>, vector<1x8x4xbf16>
    %56 = vector.shape_cast %55 : vector<1x8x4xbf16> to vector<8x4xbf16>
    %cst_20 = arith.constant dense<0.000000e+00> : vector<8x256xf32>
    %57 = tpu.matmul %56, %54, %cst_20 {dimension_numbers = #tpu.dot_dimension_numbers<[1], [0], [0], [1], [0, 0, 1, 1], [], []>} : vector<8x4xbf16>, vector<4x256xbf16>, vector<8x256xf32> -> vector<8x256xf32>
    %58 = arith.addf %44, %57 : vector<8x256xf32>
    %59 = vector.extract_strided_slice %4 {offsets = [0, 16], sizes = [4, 256], strides = [1, 1]} : vector<4x384xbf16> to vector<4x256xbf16>
    %c1_i32_21 = arith.constant 1 : i32
    %60 = vector.broadcast %c1_i32_21 : i32 to vector<1x256xi32>
    %61 = arith.cmpi sge, %24, %60 : vector<1x256xi32>
    %c17_i32_22 = arith.constant 17 : i32
    %62 = vector.broadcast %c17_i32_22 : i32 to vector<1x256xi32>
    %63 = arith.cmpi slt, %24, %62 : vector<1x256xi32>
    %64 = arith.andi %61, %63 : vector<1x256xi1>
    %cst_23 = arith.constant 0.000000e+00 : bf16
    %65 = vector.broadcast %cst_23 : bf16 to vector<4x256xbf16>
    %66 = vector.shape_cast %64 : vector<1x256xi1> to vector<1x256xi1>
    %67 = vector.broadcast %66 : vector<1x256xi1> to vector<4x256xi1>
    %68 = arith.select %67, %59, %65 : vector<4x256xi1>, vector<4x256xbf16>
    %c3 = arith.constant 3 : index
    %c0_24 = arith.constant 0 : index
    %c0_25 = arith.constant 0 : index
    %69 = vector.load %arg4[%c3, %c0_24, %c0_25] : memref<9x8x4xbf16, #tpu.memory_space<vmem>>, vector<1x8x4xbf16>
    %70 = vector.shape_cast %69 : vector<1x8x4xbf16> to vector<8x4xbf16>
    %cst_26 = arith.constant dense<0.000000e+00> : vector<8x256xf32>
    %71 = tpu.matmul %70, %68, %cst_26 {dimension_numbers = #tpu.dot_dimension_numbers<[1], [0], [0], [1], [0, 0, 1, 1], [], []>} : vector<8x4xbf16>, vector<4x256xbf16>, vector<8x256xf32> -> vector<8x256xf32>
    %72 = arith.addf %58, %71 : vector<8x256xf32>
    %73 = vector.extract_strided_slice %4 {offsets = [0, 17], sizes = [4, 256], strides = [1, 1]} : vector<4x384xbf16> to vector<4x256xbf16>
    %c4 = arith.constant 4 : index
    %c0_27 = arith.constant 0 : index
    %c0_28 = arith.constant 0 : index
    %74 = vector.load %arg4[%c4, %c0_27, %c0_28] : memref<9x8x4xbf16, #tpu.memory_space<vmem>>, vector<1x8x4xbf16>
    %75 = vector.shape_cast %74 : vector<1x8x4xbf16> to vector<8x4xbf16>
    %cst_29 = arith.constant dense<0.000000e+00> : vector<8x256xf32>
    %76 = tpu.matmul %75, %73, %cst_29 {dimension_numbers = #tpu.dot_dimension_numbers<[1], [0], [0], [1], [0, 0, 1, 1], [], []>} : vector<8x4xbf16>, vector<4x256xbf16>, vector<8x256xf32> -> vector<8x256xf32>
    %77 = arith.addf %72, %76 : vector<8x256xf32>
    %78 = vector.extract_strided_slice %4 {offsets = [0, 18], sizes = [4, 256], strides = [1, 1]} : vector<4x384xbf16> to vector<4x256xbf16>
    %c-1_i32_30 = arith.constant -1 : i32
    %79 = vector.broadcast %c-1_i32_30 : i32 to vector<1x256xi32>
    %80 = arith.cmpi sge, %24, %79 : vector<1x256xi32>
    %c15_i32_31 = arith.constant 15 : i32
    %81 = vector.broadcast %c15_i32_31 : i32 to vector<1x256xi32>
    %82 = arith.cmpi slt, %24, %81 : vector<1x256xi32>
    %83 = arith.andi %80, %82 : vector<1x256xi1>
    %cst_32 = arith.constant 0.000000e+00 : bf16
    %84 = vector.broadcast %cst_32 : bf16 to vector<4x256xbf16>
    %85 = vector.shape_cast %83 : vector<1x256xi1> to vector<1x256xi1>
    %86 = vector.broadcast %85 : vector<1x256xi1> to vector<4x256xi1>
    %87 = arith.select %86, %78, %84 : vector<4x256xi1>, vector<4x256xbf16>
    %c5 = arith.constant 5 : index
    %c0_33 = arith.constant 0 : index
    %c0_34 = arith.constant 0 : index
    %88 = vector.load %arg4[%c5, %c0_33, %c0_34] : memref<9x8x4xbf16, #tpu.memory_space<vmem>>, vector<1x8x4xbf16>
    %89 = vector.shape_cast %88 : vector<1x8x4xbf16> to vector<8x4xbf16>
    %cst_35 = arith.constant dense<0.000000e+00> : vector<8x256xf32>
    %90 = tpu.matmul %89, %87, %cst_35 {dimension_numbers = #tpu.dot_dimension_numbers<[1], [0], [0], [1], [0, 0, 1, 1], [], []>} : vector<8x4xbf16>, vector<4x256xbf16>, vector<8x256xf32> -> vector<8x256xf32>
    %91 = arith.addf %77, %90 : vector<8x256xf32>
    %92 = vector.extract_strided_slice %4 {offsets = [0, 32], sizes = [4, 256], strides = [1, 1]} : vector<4x384xbf16> to vector<4x256xbf16>
    %c1_i32_36 = arith.constant 1 : i32
    %93 = vector.broadcast %c1_i32_36 : i32 to vector<1x256xi32>
    %94 = arith.cmpi sge, %24, %93 : vector<1x256xi32>
    %c17_i32_37 = arith.constant 17 : i32
    %95 = vector.broadcast %c17_i32_37 : i32 to vector<1x256xi32>
    %96 = arith.cmpi slt, %24, %95 : vector<1x256xi32>
    %97 = arith.andi %94, %96 : vector<1x256xi1>
    %cst_38 = arith.constant 0.000000e+00 : bf16
    %98 = vector.broadcast %cst_38 : bf16 to vector<4x256xbf16>
    %99 = vector.shape_cast %97 : vector<1x256xi1> to vector<1x256xi1>
    %100 = vector.broadcast %99 : vector<1x256xi1> to vector<4x256xi1>
    %101 = arith.select %100, %92, %98 : vector<4x256xi1>, vector<4x256xbf16>
    %c6 = arith.constant 6 : index
    %c0_39 = arith.constant 0 : index
    %c0_40 = arith.constant 0 : index
    %102 = vector.load %arg4[%c6, %c0_39, %c0_40] : memref<9x8x4xbf16, #tpu.memory_space<vmem>>, vector<1x8x4xbf16>
    %103 = vector.shape_cast %102 : vector<1x8x4xbf16> to vector<8x4xbf16>
    %cst_41 = arith.constant dense<0.000000e+00> : vector<8x256xf32>
    %104 = tpu.matmul %103, %101, %cst_41 {dimension_numbers = #tpu.dot_dimension_numbers<[1], [0], [0], [1], [0, 0, 1, 1], [], []>} : vector<8x4xbf16>, vector<4x256xbf16>, vector<8x256xf32> -> vector<8x256xf32>
    %105 = arith.addf %91, %104 : vector<8x256xf32>
    %106 = vector.extract_strided_slice %4 {offsets = [0, 33], sizes = [4, 256], strides = [1, 1]} : vector<4x384xbf16> to vector<4x256xbf16>
    %c7 = arith.constant 7 : index
    %c0_42 = arith.constant 0 : index
    %c0_43 = arith.constant 0 : index
    %107 = vector.load %arg4[%c7, %c0_42, %c0_43] : memref<9x8x4xbf16, #tpu.memory_space<vmem>>, vector<1x8x4xbf16>
    %108 = vector.shape_cast %107 : vector<1x8x4xbf16> to vector<8x4xbf16>
    %cst_44 = arith.constant dense<0.000000e+00> : vector<8x256xf32>
    %109 = tpu.matmul %108, %106, %cst_44 {dimension_numbers = #tpu.dot_dimension_numbers<[1], [0], [0], [1], [0, 0, 1, 1], [], []>} : vector<8x4xbf16>, vector<4x256xbf16>, vector<8x256xf32> -> vector<8x256xf32>
    %110 = arith.addf %105, %109 : vector<8x256xf32>
    %111 = vector.extract_strided_slice %4 {offsets = [0, 34], sizes = [4, 256], strides = [1, 1]} : vector<4x384xbf16> to vector<4x256xbf16>
    %c-1_i32_45 = arith.constant -1 : i32
    %112 = vector.broadcast %c-1_i32_45 : i32 to vector<1x256xi32>
    %113 = arith.cmpi sge, %24, %112 : vector<1x256xi32>
    %c15_i32_46 = arith.constant 15 : i32
    %114 = vector.broadcast %c15_i32_46 : i32 to vector<1x256xi32>
    %115 = arith.cmpi slt, %24, %114 : vector<1x256xi32>
    %116 = arith.andi %113, %115 : vector<1x256xi1>
    %cst_47 = arith.constant 0.000000e+00 : bf16
    %117 = vector.broadcast %cst_47 : bf16 to vector<4x256xbf16>
    %118 = vector.shape_cast %116 : vector<1x256xi1> to vector<1x256xi1>
    %119 = vector.broadcast %118 : vector<1x256xi1> to vector<4x256xi1>
    %120 = arith.select %119, %111, %117 : vector<4x256xi1>, vector<4x256xbf16>
    %c8 = arith.constant 8 : index
    %c0_48 = arith.constant 0 : index
    %c0_49 = arith.constant 0 : index
    %121 = vector.load %arg4[%c8, %c0_48, %c0_49] : memref<9x8x4xbf16, #tpu.memory_space<vmem>>, vector<1x8x4xbf16>
    %122 = vector.shape_cast %121 : vector<1x8x4xbf16> to vector<8x4xbf16>
    %cst_50 = arith.constant dense<0.000000e+00> : vector<8x256xf32>
    %123 = tpu.matmul %122, %120, %cst_50 {dimension_numbers = #tpu.dot_dimension_numbers<[1], [0], [0], [1], [0, 0, 1, 1], [], []>} : vector<8x4xbf16>, vector<4x256xbf16>, vector<8x256xf32> -> vector<8x256xf32>
    %124 = arith.addf %110, %123 : vector<8x256xf32>
    %c0_51 = arith.constant 0 : index
    %c0_52 = arith.constant 0 : index
    %125 = vector.load %arg5[%c0_51, %c0_52] : memref<8x1xf32, #tpu.memory_space<vmem>>, vector<8x1xf32>
    %126 = vector.broadcast %125 : vector<8x1xf32> to vector<8x256xf32>
    %127 = arith.addf %124, %126 : vector<8x256xf32>
    %cst_53 = arith.constant 0.000000e+00 : f32
    %128 = vector.broadcast %cst_53 : f32 to vector<8x256xf32>
    %129 = arith.cmpf oge, %127, %128 : vector<8x256xf32>
    %cst_54 = arith.constant 0.00999999977 : f32
    %130 = vector.broadcast %cst_54 : f32 to vector<8x256xf32>
    %131 = arith.mulf %130, %127 : vector<8x256xf32>
    %132 = arith.select %129, %127, %131 : vector<8x256xi1>, vector<8x256xf32>
    %c0_55 = arith.constant 0 : index
    %c0_56 = arith.constant 0 : index
    %c0_57 = arith.constant 0 : index
    %133 = vector.load %arg6[%c0_55, %c0_56, %c0_57] : memref<1x8x256xf32, #tpu.memory_space<vmem>>, vector<1x8x256xf32>
    %134 = vector.shape_cast %133 : vector<1x8x256xf32> to vector<8x256xf32>
    %135 = vector.shape_cast %132 : vector<8x256xf32> to vector<1x8x256xf32>
    tpu.vector_store %arg6[%c0_55, %c0_56, %c0_57], %135 {strides = array<i32>} : memref<1x8x256xf32, #tpu.memory_space<vmem>>, vector<1x8x256xf32>,
    %c0_58 = arith.constant 0 : index
    %c0_59 = arith.constant 0 : index
    %c0_60 = arith.constant 0 : index
    %136 = vector.load %arg7[%c0_58, %c0_59, %c0_60] : memref<1x8x256xf32, #tpu.memory_space<vmem>>, vector<1x8x256xf32>
    %137 = vector.shape_cast %136 : vector<1x8x256xf32> to vector<8x256xf32>
    %138 = vector.shape_cast %127 : vector<8x256xf32> to vector<1x8x256xf32>
    tpu.vector_store %arg7[%c0_58, %c0_59, %c0_60], %138 {strides = array<i32>} : memref<1x8x256xf32, #tpu.memory_space<vmem>>, vector<1x8x256xf32>,
    return
  }
  func.func @transform_0(%arg0: i32, %arg1: i32) -> (i32, i32, i32) {
    %c0_i32 = arith.constant 0 : i32
    %c0_i32_0 = arith.constant 0 : i32
    return %arg0, %c0_i32, %arg1 : i32, i32, i32
  }
  func.func @transform_1(%arg0: i32, %arg1: i32) -> (i32, i32, i32) {
    %c1_i32 = arith.constant 1 : i32
    %0 = arith.addi %arg1, %c1_i32 : i32
    %c2_i32 = arith.constant 2 : i32
    %1 = arith.muli %0, %c2_i32 : i32
    %c0_i32 = arith.constant 0 : i32
    %c0_i32_0 = arith.constant 0 : i32
    return %arg0, %c0_i32, %1 : i32, i32, i32
  }
  func.func @transform_2(%arg0: i32, %arg1: i32) -> (i32, i32, i32) {
    %c0_i32 = arith.constant 0 : i32
    %c0_i32_0 = arith.constant 0 : i32
    %c0_i32_1 = arith.constant 0 : i32
    %c0_i32_2 = arith.constant 0 : i32
    return %c0_i32, %c0_i32_0, %c0_i32_1 : i32, i32, i32
  }
  func.func @transform_3(%arg0: i32, %arg1: i32) -> (i32, i32) {
    %c0_i32 = arith.constant 0 : i32
    %c0_i32_0 = arith.constant 0 : i32
    %c0_i32_1 = arith.constant 0 : i32
    return %c0_i32, %c0_i32_0 : i32, i32
  }
  func.func @transform_4(%arg0: i32, %arg1: i32) -> (i32, i32, i32) {
    %c0_i32 = arith.constant 0 : i32
    %c0_i32_0 = arith.constant 0 : i32
    return %arg0, %c0_i32, %arg1 : i32, i32, i32
  }
  func.func @transform_5(%arg0: i32, %arg1: i32) -> (i32, i32, i32) {
    %c0_i32 = arith.constant 0 : i32
    %c0_i32_0 = arith.constant 0 : i32
    return %arg0, %c0_i32, %arg1 : i32, i32, i32
  }
}

</mosaic_0001>

<bundles_post_ra>
// kernel: tpu_custom_call.1
= control target key start
LH: loop header
LB: loop body
LE: loop exit
PB: predicated region body
PF: predicated region fallthrough
CT: control target
= control target key end

     0   :  { %11 = vsyncpa [#allocation3], 0  ;;  %s1770_s0 = inlined_call_operand.vmem [shape: bf16[2,4,512], index: 0, kind: input, shape index: {}]   ;;  %s1771_s1 = inlined_call_operand.vmem [shape: bf16[2,4,512], index: 1, kind: input, shape index: {}]   ;;  %s1772_s2 = inlined_call_operand.vmem [shape: bf16[9,8,4], index: 2, kind: input, shape index: {}]   ;;  %s1773_s3 = inlined_call_operand.vmem [shape: f32[8,1], index: 3, kind: input, shape index: {}]   ;;  %s1774_s4 = inlined_call_operand.hbm [shape: f32[2,8,256], index: 4, kind: output, shape index: {0}]   ;;  %s1775_s5 = inlined_call_operand.hbm [shape: f32[2,8,256], index: 5, kind: output, shape index: {1}]  }
   0x1   :  { %13 = vsyncpa [#allocation3 + $0x1], 0 }
   0x2   :  { %14 = vsyncpa [#allocation5], 0 }
   0x3   :  { %16 = vsyncpa [#allocation5 + $0x1], 0  ;;  %s1505_s18 = smov 0   ;;  %s1507_s19 = smov 0  }
   0x4   :  { %s1509_s20 = smov 0   ;;  %s1511_s21 = smov 0  }
   0x5   :  { %s1513_s22 = smov 0   ;;  %s1515_s23 = smov 0  }
   0x6 LB: > { %s1220_s24 = sadd.s32 4294967295, %s1457_s23   ;;  %s1221_s25 = sadd.s32 4294967294, %s1457_s23   ;;  %s1457_s23 = sphi %s1515_s23, %s22_s23   ;;  %s1453_s22 = sphi %s1513_s22, %s1782_s22   ;;  %s1449_s21 = sphi %s1511_s21, %s1781_s21   ;;  %s1445_s20 = sphi %s1509_s20, %s1780_s20   ;;  %s1441_s19 = sphi %s1507_s19, %s1779_s19   ;;  %s1437_s18 = sphi %s1505_s18, %s1778_s18  }
   0x7   : > { %s34_s26 = sadd.s32 1, %s1453_s22  ;;  %s145_s27 = sadd.s32 1, %s1445_s20 }
   0x8   : > { %p36_p0 = scmp.ge.s32.totalorder %s34_s26, 2  ;;  %p155_p1 = scmp.ne.s32.totalorder %s1445_s20, %s1441_s19 }
   0x9   : > { %p156_p2 = scmp.eq.s32.totalorder %s1220_s24, 1  ;;  %p161_p3 = scmp.ne.s32.totalorder %s1441_s19, %s1437_s18 }
   0xa   : > { %s1784_s26 = smov (%p36_p0, %s34_s26), 0  ;;  %p162_p5 = scmp.eq.s32.totalorder %s1221_s25, 1 }
   0xb   : > { %p1545_p4 = por %p156_p2, %p155_p1  ;;  %s140_s29 = ssub.s32 %s1453_s22, %s1784_s26 }
   0xc   : > { %p1224_p6 = scmp.ge.s32.totalorder %s1457_s23, 1  ;;  %p143_p7 = scmp.eq.s32.totalorder %s140_s29, 0 }
   0xd   : > { %p1552_p8 = por %p162_p5, %p161_p3  ;;  %p242_p9 = scmp.lt.s32.totalorder %s1457_s23, 3 }
   0xe   : > { %s1558_s6 = scalar_select %p143_p7, %s1445_s20, %s145_s27  }
   0xf   : > { %p243_p10 = pnand %p1224_p6, %p242_p9 }
  0x10   : > { %v330_v0 = vlaneseq (!%p243_p10)  ;;  %v1459_v1 = vmov (!%p243_p10), 0   ;;  %s1460_s7 = smov (!%p243_p10), 2   ;;  %p290_p11 = scmp.lt.s32.totalorder (!%p243_p10), %s1449_s21, 1  ;;  %vm401_vm8 = vcmask (!%p243_p10), 1041408   ;;  %vm397_vm9 = vcmask (!%p243_p10), 31744   ;;  %v1035_v59 = vld [vmem:[%s1773_s3] sm:$0xff] (!%p243_p10) }
  0x11   : > { %246 = sbr.rel (%p243_p10) target bundleno = 557 (0x22d), region = 36  ;;  %440 = vmatprep.mubr.bf16.mxu0 (!%p243_p10), %v1459_v1  ;;  %490 = vmatprep.mubr.bf16.mxu1 (!%p243_p10), %v1459_v1  ;;  %s1461_s8 = smov (!%p243_p10), 16   ;;  %v384_v21 = vld [vmem:[%s1772_s2] sm:$0xf] (!%p243_p10)  ;;  %vm523_vm12 = vcmask (!%p243_p10), 15360  }
  0x12   : > { %v331_v2 = vand.u32 (!%p243_p10), 127, %v330_v0  ;;  %1346 = vset.pattern.permute.xlu0 (!%p243_p10), %v1459_v1  ;;  %v373_v3 = vshrl.u32 (!%p243_p10), %v330_v0, 7  ;;  %s1462_s10 = smov (!%p243_p10), 18   ;;  %s1463_s15 = smov (!%p243_p10), 32   ;;  %v1232_v55 = vld [vmem:[%s1772_s2 + $0x4] sm:$0xf] (!%p243_p10) }
  0x13   : > { %s1464_s17 = smov (!%p243_p10), 34   ;;  %s1465_s29 = smov (!%p243_p10), 127  }
  0x14   : > { %v332_v4 = vadd.s32 (!%p243_p10), 128, %v331_v2  ;;  %v340_v5 = vand.u32 (!%p243_p10), 15, %v331_v2  ;;  %v374_v7 = vsub.s32 (!%p243_p10), 0, %v373_v3  ;;  %v378_v8 = vsub.s32 (!%p243_p10), 4, %v373_v3  ;;  %s1469_s12 = smov (!%p243_p10), 96   ;;  %s1470_s13 = smov (!%p243_p10), 110  }
  0x15   : > { %s1680_s25 = sand.u32 (!%p243_p10), 1, %s1441_s19   ;;  %s1473_s24 = smov (!%p243_p10), [#allocation4]  }
  0x16   : > { %v347_v6 = vand.u32 (!%p243_p10), 15, %v332_v4  ;;  %vm501_vm0 = vcmp.lt.s32.totalorder (!%p243_p10), %v340_v5, 15  ;;  %vm360_vm1 = vcmp.ge.s32.totalorder (!%p243_p10), %v340_v5, 1 }
  0x18   : > { %vm502_vm2 = vcmp.lt.s32.totalorder %v347_v6, 15  ;;  %vm361_vm3 = vcmp.ge.s32.totalorder %v347_v6, 1  ;;  %s291_s9 = scalar_select %p290_p11, %s1449_s21, 1 }
  0x19   : > { %vm509_vm4 = vmpackc.low %vm502_vm2, %vm501_vm0  ;;  %vm601_vm0 = vcmask 130048  }
  0x1a   : > { %v510_v9 = vsel %vm509_vm4, 65537, %v1459_v1  ;;  %vm370_vm5 = vmpackc.low %vm361_vm3, %vm360_vm1  ;;  %s1266_s11 = sshll.u32 %s291_s9, 3 }
  0x1b   : > { %v514_v10 = vrot.slane %v510_v9, %v374_v7  ;;  %v371_v11 = vsel %vm370_vm5, 65537, %v1459_v1  ;;  %v518_v13 = vrot.slane %v510_v9, %v378_v8  ;;  %s297_s14 = scalar_lea.vmem %s1770_s0, %s1266_s11  ;;  %s1268_s16 = sadd.s32 4, %s1266_s11  ;;  %vm742_vm5 = vcmask 146432  }
  0x1c   : > { %v375_v12 = vrot.slane %v371_v11, %v374_v7  ;;  %v379_v14 = vrot.slane %v371_v11, %v378_v8  ;;  %v1570_v15 = vld.sshfl [vmem:[%s297_s14] sm:$0x33 pattern:$0x76325410]  ;;  %s308_s27 = scalar_lea.vmem %s1771_s1, %s1268_s16  ;;  %s1468_s11 = smov 112  }
  0x1d   : > { %519 = vrot.lane.b32.xlu0 %v514_v10, %s1460_s7  ;;  %v1574_v16 = vcombine.high %v1570_v15, %v1570_v15  ;;  %v1581_v17 = vld [vmem:[%s308_s27] sm:$0x3]  ;;  %s1471_s14 = smov 95   ;;  %v1237_v11 = vld [vmem:[%s1772_s2 + $0x8] sm:$0xf]  ;;  %s1225_s27 = sshll.u32 %s1680_s25, 4 }
  0x1e   : > { %597 = vrot.lane.b32.xlu1 %v375_v12, %s1461_s8  ;;  %vm381_vm6 = vcmp.ne.s16.totalorder %v379_v14, 0  ;;  %vm380_vm7 = vcmp.ne.s16.totalorder %v375_v12, 0  ;;  %s1684_s9 = scalar_lea.vmem [#allocation2], %s1225_s27  ;;  %s1059_s16 = scalar_lea.sflag [#allocation5], %s1680_s25 }
  0x1f   : > { %v383_v18 = vsel %vm381_vm6, %v1574_v16, 0  ;;  %v382_v19 = vsel %vm380_vm7, %v1570_v15, 0  ;;  %vm820_vm7 = vcmask 261120  }
  0x20   : > { %1235 = vmatprep.subr.msk.bf16.mxu1 %vm401_vm8, %v383_v18  ;;  %v453_v20 = vsel %vm401_vm8, %v382_v19, 0  ;;  %v1240_v19 = vld [vmem:[%s1772_s2 + $0xc] sm:$0xf] }
  0x21   : > { %521 = vrot.lane.b32.xlu0 %v518_v13, %s1460_s7  ;;  %s1466_s7 = smov 111   ;;  %459 = vmatpush1.bf16.msra.mxu1 %v453_v20 }
  0x22   : > { %599 = vrot.lane.b32.xlu1 %v379_v14, %s1461_s8 }
  0x24   : > { %1236 = vmatmul.mubr.msk.bf16.vlgmr.msra.gmra.mrb[0].mxu1 %vm397_vm9, %v384_v21  ;;  %v1243_v21 = vld [vmem:[%s1772_s2 + $0x10] sm:$0xf] }
  0x25   : > { %738 = vrot.lane.b32.xlu0 %v514_v10, %s1462_s10  ;;  %664 = vmatprep.mubr.bf16.mxu1 %v1459_v1 }
  0x26   : > { %740 = vrot.lane.b32.xlu1 %v518_v13, %s1462_s10  ;;  %s1467_s10 = smov 126  }
  0x29   : > { %816 = vrot.lane.b32.xlu0 %v375_v12, %s1463_s15 }
  0x2a   : > { %818 = vrot.lane.b32.xlu1 %v379_v14, %s1463_s15 }
  0x2d   : > { %957 = vrot.lane.b32.xlu0 %v514_v10, %s1464_s17 }
  0x2e   : > { %959 = vrot.lane.b32.xlu1 %v518_v13, %s1464_s17  ;;  %s1472_s17 = smov 94  }
  0x31   : > { %388 = vrot.lane.b32.xlu0 %v1570_v15, %s1465_s29 }
  0x32   : > { %390 = vrot.lane.b32.xlu1 %v1574_v16, %s1465_s29 }
  0x35   : > { %392 = vrot.lane.b32.xlu0 %v1581_v17, %s1465_s29  ;;  %s1269_s29 = sshll.u32 %s1449_s21, 8 }
  0x36   : > { %677 = vrot.lane.b32.xlu1 %v1570_v15, %s1466_s7  ;;  %s1697_s15 = scalar_lea.hbm %s1774_s4, %s1269_s29 }
  0x39   : > { %679 = vrot.lane.b32.xlu0 %v1574_v16, %s1466_s7 }
  0x3a   : > { %681 = vrot.lane.b32.xlu1 %v1581_v17, %s1466_s7  ;;  %s288_s7 = scalar_lea.vmem [#allocation4], %s1225_s27  ;;  %s1351_s27 = sshll.u32 %s1473_s24, 4  ;;  %s1352_s27 = int_to_ptr.vmem [resolvable:$false] %s1351_s27 }
  0x3b   : > { %s1091_s8 = sshll.u32 %s288_s7, 4  ;;  %s1692_s8 = int_to_ptr.vmem [resolvable:$true] %s1091_s8 }
  0x3c   : > { %p1354_p1 = scmp.lt.s32.totalorder %s1692_s8, %s1352_s27 }
  0x8f   : > { %v520_v22 = vpop.permute.xlu0 %519 }
  0x90   : > { %vm525_vm10 = vcmp.ne.s16.totalorder %v520_v22, 0  ;;  %v598_v23 = vpop.permute.xlu1 %597 }
  0x91   : > { %vm603_vm11 = vcmp.ne.s16.totalorder %v598_v23, 0  ;;  %v528_v24 = vsel %vm525_vm10, %v1570_v15, 0  ;;  %vm394_vm10 = vcmask 1039360  }
  0x92   : > { %v606_v25 = vsel %vm603_vm11, %v1570_v15, 0  ;;  %536 = vrot.lane.b32.xlu1 %v528_v24, %s1467_s10 }
  0x93   : > { %614 = vrot.lane.b32.xlu0 %v606_v25, %s1468_s11  ;;  %v522_v26 = vpop.permute.xlu0 %521 }
  0x94   : > { %v524_v27 = vsel %vm523_vm12, %v520_v22, %v522_v26  ;;  %vm527_vm13 = vcmp.ne.s16.totalorder %v522_v26, 0  ;;  %v600_v28 = vpop.permute.xlu1 %599 }
  0x95   : > { %vm605_vm14 = vcmp.ne.s16.totalorder %v600_v28, 0  ;;  %v530_v29 = vsel %vm527_vm13, %v1581_v17, 0  ;;  %vm526_vm15 = vcmp.ne.s16.totalorder %v524_v27, 0  ;;  %v602_v34 = vsel %vm601_vm0, %v598_v23, %v600_v28 }
  0x96   : > { %v608_v30 = vsel %vm605_vm14, %v1581_v17, 0  ;;  %540 = vrot.lane.b32.xlu1 %v530_v29, %s1467_s10  ;;  %v529_v33 = vsel %vm526_vm15, %v1574_v16, 0  ;;  %vm604_vm4 = vcmp.ne.s16.totalorder %v602_v34, 0  ;;  %vm961_vm13 = vcmask 277504  }
  0x97   : > { %618 = vrot.lane.b32.xlu0 %v608_v30, %s1468_s11  ;;  %v739_v31 = vpop.permute.xlu0 %738  ;;  %v607_v42 = vsel %vm604_vm4, %v1574_v16, 0  ;;  %vm761_vm4 = vcmask 900096  }
  0x98   : > { %v741_v32 = vpop.permute.xlu1 %740  ;;  %vm744_vm1 = vcmp.ne.s16.totalorder %v739_v31, 0 }
  0x99   : > { %vm746_vm3 = vcmp.ne.s16.totalorder %v741_v32, 0  ;;  %v747_v38 = vsel %vm744_vm1, %v1570_v15, 0  ;;  %v743_v43 = vsel %vm742_vm5, %v739_v31, %v741_v32  ;;  %vm542_vm1 = vcmask 1031168   ;;  %v1246_v31 = vld [vmem:[%s1772_s2 + $0x14] sm:$0xf] }
  0x9a   : > { %v749_v40 = vsel %vm746_vm3, %v1581_v17, 0  ;;  %vm745_vm11 = vcmp.ne.s16.totalorder %v743_v43, 0  ;;  %vm620_vm3 = vcmask 916480   ;;  %vm839_vm5 = vcmask 785408  }
  0x9b   : > { %538 = vrot.lane.b32.xlu0 %v529_v33, %s1467_s10  ;;  %v817_v35 = vpop.permute.xlu0 %816  ;;  %v748_v52 = vsel %vm745_vm11, %v1574_v16, 0  ;;  %v1249_v33 = vld [vmem:[%s1772_s2 + $0x18] sm:$0xf]  ;;  %s1075_s10 = sshll.u32 %s1684_s9, 4  ;;  %s1699_s10 = int_to_ptr.vmem [resolvable:$true] %s1075_s10 }
  0x9c   : > { %vm822_vm2 = vcmp.ne.s16.totalorder %v817_v35, 0  ;;  %v819_v36 = vpop.permute.xlu1 %818 }
  0x9d   : > { %v825_v37 = vsel %vm822_vm2, %v1570_v15, 0  ;;  %vm824_vm6 = vcmp.ne.s16.totalorder %v819_v36, 0  ;;  %v821_v46 = vsel %vm820_vm7, %v817_v35, %v819_v36  ;;  %vm683_vm2 = vcmask 908288  }
  0x9e   : > { %833 = vrot.lane.b32.xlu1 %v825_v37, %s1469_s12  ;;  %v827_v44 = vsel %vm824_vm6, %v1581_v17, 0  ;;  %vm823_vm12 = vcmp.ne.s16.totalorder %v821_v46, 0  ;;  %vm902_vm6 = vcmask 777216   ;;  %vm980_vm7 = vcmask 769024  }
  0x9f   : > { %755 = vrot.lane.b32.xlu0 %v747_v38, %s1470_s13  ;;  %v958_v39 = vpop.permute.xlu0 %957  ;;  %v826_v53 = vsel %vm823_vm12, %v1574_v16, 0 }
  0xa0   : > { %v960_v41 = vpop.permute.xlu1 %959  ;;  %vm963_vm14 = vcmp.ne.s16.totalorder %v958_v39, 0 }
  0xa1   : > { %v962_v54 = vsel %vm961_vm13, %v958_v39, %v960_v41  ;;  %v966_v56 = vsel %vm963_vm14, %v1570_v15, 0  ;;  %vm965_vm0 = vcmp.ne.s16.totalorder %v960_v41, 0  ;;  %v1252_v41 = vld [vmem:[%s1772_s2 + $0x1c] sm:$0xf] }
  0xa2   : > { %616 = vrot.lane.b32.xlu1 %v607_v42, %s1468_s11  ;;  %vm964_vm15 = vcmp.ne.s16.totalorder %v962_v54, 0  ;;  %v968_v58 = vsel %vm965_vm0, %v1581_v17, 0  ;;  %s1353_s11 = scalar_lea.vmem %s1352_s27, 512 }
  0xa3   : > { %759 = vrot.lane.b32.xlu0 %v749_v40, %s1470_s13  ;;  %v389_v45 = vpop.permute.xlu0 %388  ;;  %v967_v57 = vsel %vm964_vm15, %v1574_v16, 0 }
  0xa4   : > { %v391_v47 = vpop.permute.xlu1 %390 }
  0xa5   : > { %v395_v48 = vsel %vm394_vm10, %v389_v45, %v391_v47  ;;  %v1255_v45 = vld [vmem:[%s1772_s2 + $0x20] sm:$0xf] }
  0xa6   : > { %837 = vrot.lane.b32.xlu1 %v827_v44, %s1469_s12  ;;  %v403_v50 = vsel %vm401_vm8, %v395_v48, 0 }
  0xa7   : > { %896 = vrot.lane.b32.xlu0 %v1570_v15, %s1471_s14  ;;  %v393_v49 = vpop.permute.xlu0 %392 }
  0xa8   : > { %v396_v51 = vsel %vm394_vm10, %v391_v47, %v393_v49  ;;  %v678_v60 = vpop.permute.xlu1 %677 }
  0xa9   : > { %1233 = vmatprep.subr.msk.bf16.mxu0 %vm401_vm8, %v396_v51 }
  0xaa   : > { %757 = vrot.lane.b32.xlu1 %v748_v52, %s1470_s13  ;;  %409 = vmatpush1.bf16.msra.mxu0 %v403_v50  ;;  %s1690_s13 = scalar_lea.hbm %s1775_s5, %s1269_s29 }
  0xab   : > { %835 = vrot.lane.b32.xlu0 %v826_v53, %s1469_s12  ;;  %v680_v61 = vpop.permute.xlu0 %679 }
  0xac   : > { %v682_v62 = vpop.permute.xlu1 %681  ;;  %v684_v8 = vsel %vm683_vm2, %v678_v60, %v680_v61 }
  0xad   : > { %1234 = vmatmul.mubr.msk.bf16.vlgmr.msra.gmra.mrb[0].mxu0 %vm397_vm9, %v1232_v55  ;;  %v685_v9 = vsel %vm683_vm2, %v680_v61, %v682_v62  ;;  %v690_v13 = vsel %vm401_vm8, %v684_v8, 0 }
  0xae   : > { %898 = vrot.lane.b32.xlu1 %v1574_v16, %s1471_s14  ;;  %586 = vmatprep.mubr.bf16.mxu0 %v1459_v1 }
  0xaf   : > { %900 = vrot.lane.b32.xlu0 %v1581_v17, %s1471_s14 }
  0xb2   : > { %974 = vrot.lane.b32.xlu1 %v966_v56, %s1472_s17 }
  0xb3   : > { %976 = vrot.lane.b32.xlu0 %v967_v57, %s1472_s17 }
  0xb6   : > { %978 = vrot.lane.b32.xlu1 %v968_v58, %s1472_s17  ;;  %s1347_s17 = scalar_lea.vmem %s1692_s8, 256 }
  0xb7   : > { %1038 = vperm.xlu0 %1346, %v1035_v59   ;;  %p1348_p12 = scmp.ne.s32.totalorder %s1692_s8, %s1347_s17  ;;  %p1355_p2 = scmp.lt.s32.totalorder %s1353_s11, %s1347_s17 }
  0xb9   : > { %p1349_p13 = pnand %p1348_p12, %p1545_p4  ;;  %p1356_p3 = por %p1355_p2, %p1354_p1 }
  0xbb   : > { %p1350_p0 = pneg %p1349_p13 }
  0xbd   : > { %p1357_p5 = pnand %p1356_p3, %p1350_p0 }
 0x104   : > { %v537_v0 = vpop.permute.xlu1 %536 }
 0x105   : > { %v615_v63 = vpop.permute.xlu0 %614 }
 0x108   : > { %v541_v3 = vpop.permute.xlu1 %540 }
 0x109   : > { %v619_v2 = vpop.permute.xlu0 %618 }
 0x10d   : > { %v539_v4 = vpop.permute.xlu0 %538 }
 0x10e   : > { %v543_v5 = vsel %vm542_vm1, %v537_v0, %v539_v4  ;;  %v544_v6 = vsel %vm542_vm1, %v539_v4, %v541_v3 }
 0x10f   : > { %v549_v7 = vsel %vm401_vm8, %v543_v5, 0  ;;  %1238 = vmatprep.subr.msk.bf16.mxu0 %vm401_vm8, %v544_v6 }
 0x110   : > { %555 = vmatpush1.bf16.msra.mxu0 %v549_v7  ;;  %v834_v10 = vpop.permute.xlu1 %833 }
 0x111   : > { %1244 = vmatprep.subr.msk.bf16.mxu0 %vm401_vm8, %v685_v9  ;;  %v756_v12 = vpop.permute.xlu0 %755 }
 0x113   : > { %1239 = vmatmul.mubr.msk.bf16.vlgmr.msra.gmra.mrb[4].mxu0 %vm397_vm9, %v1237_v11 }
 0x114   : > { %696 = vmatpush1.bf16.msra.mxu0 %v690_v13  ;;  %v617_v14 = vpop.permute.xlu1 %616  ;;  %727 = vmatprep.mubr.bf16.mxu0 %v1459_v1 }
 0x115   : > { %v621_v15 = vsel %vm620_vm3, %v615_v63, %v617_v14  ;;  %v622_v16 = vsel %vm620_vm3, %v617_v14, %v619_v2  ;;  %v760_v17 = vpop.permute.xlu0 %759 }
 0x116   : > { %v627_v18 = vsel %vm401_vm8, %v621_v15, 0  ;;  %1241 = vmatprep.subr.msk.bf16.mxu1 %vm401_vm8, %v622_v16 }
 0x117   : > { %633 = vmatpush1.bf16.msra.mxu1 %v627_v18 }
 0x118   : > { %v838_v20 = vpop.permute.xlu1 %837 }
 0x119   : > { %v897_v22 = vpop.permute.xlu0 %896 }
 0x11a   : > { %1242 = vmatmul.mubr.msk.bf16.vlgmr.msra.gmra.mrb[4].mxu1 %vm397_vm9, %v1240_v19 }
 0x11b   : > { %1245 = vmatmul.mubr.msk.bf16.vlgmr.msra.gmra.mrb[8].mxu0 %vm397_vm9, %v1243_v21  ;;  %805 = vmatprep.mubr.bf16.mxu1 %v1459_v1 }
 0x11c   : > { %v758_v23 = vpop.permute.xlu1 %757  ;;  %883 = vmatprep.mubr.bf16.mxu0 %v1459_v1 }
 0x11d   : > { %v762_v24 = vsel %vm761_vm4, %v756_v12, %v758_v23  ;;  %v763_v25 = vsel %vm761_vm4, %v758_v23, %v760_v17  ;;  %v836_v26 = vpop.permute.xlu0 %835 }
 0x11e   : > { %v768_v27 = vsel %vm401_vm8, %v762_v24, 0  ;;  %v840_v28 = vsel %vm839_vm5, %v834_v10, %v836_v26  ;;  %v841_v29 = vsel %vm839_vm5, %v836_v26, %v838_v20  ;;  %1247 = vmatprep.subr.msk.bf16.mxu1 %vm401_vm8, %v763_v25 }
 0x11f   : > { %v846_v30 = vsel %vm401_vm8, %v840_v28, 0  ;;  %1250 = vmatprep.subr.msk.bf16.mxu0 %vm401_vm8, %v841_v29  ;;  %774 = vmatpush1.bf16.msra.mxu1 %v768_v27 }
 0x120   : > { %852 = vmatpush1.bf16.msra.mxu0 %v846_v30  ;;  %v899_v32 = vpop.permute.xlu1 %898 }
 0x121   : > { %v903_v34 = vsel %vm902_vm6, %v897_v22, %v899_v32  ;;  %v901_v35 = vpop.permute.xlu0 %900 }
 0x122   : > { %v909_v36 = vsel %vm401_vm8, %v903_v34, 0  ;;  %v904_v37 = vsel %vm902_vm6, %v899_v32, %v901_v35  ;;  %1248 = vmatmul.mubr.msk.bf16.vlgmr.msra.gmra.mrb[8].mxu1 %vm397_vm9, %v1246_v31 }
 0x123   : > { %1253 = vmatprep.subr.msk.bf16.mxu1 %vm401_vm8, %v904_v37  ;;  %1251 = vmatmul.mubr.msk.bf16.vlgmr.msra.gmra.mrb[12].mxu0 %vm397_vm9, %v1249_v33 }
 0x124   : > { %915 = vmatpush1.bf16.msra.mxu1 %v909_v36  ;;  %v975_v38 = vpop.permute.xlu1 %974  ;;  %946 = vmatprep.mubr.bf16.mxu1 %v1459_v1 }
 0x125   : > { %v977_v39 = vpop.permute.xlu0 %976  ;;  %1024 = vmatprep.mubr.bf16.mxu0 %v1459_v1  ;;  %v492_v1 = vpop.f32.mrb[0].mxu1 }
 0x126   : > { %v981_v40 = vsel %vm980_vm7, %v975_v38, %v977_v39  ;;  %v494_v46 = vpop.f32.mrb[1].mxu1 }
 0x127   : > { %v987_v44 = vsel %vm401_vm8, %v981_v40, 0  ;;  %v496_v47 = vpop.f32.mrb[2].mxu1 }
 0x128   : > { %v979_v42 = vpop.permute.xlu1 %978  ;;  %v497_v48 = vpop.f32.mrb[3].mxu1 }
 0x129   : > { %v982_v43 = vsel %vm980_vm7, %v977_v39, %v979_v42 }
 0x12a   : > { %1254 = vmatmul.mubr.msk.bf16.vlgmr.msra.gmra.mrb[12].mxu1 %vm397_vm9, %v1252_v41  ;;  %1256 = vmatprep.subr.msk.bf16.mxu0 %vm401_vm8, %v982_v43 }
 0x12b   : > { %993 = vmatpush1.bf16.msra.mxu0 %v987_v44 }
 0x12e   : > { %1257 = vmatmul.mubr.msk.bf16.vlgmr.msra.gmra.mrb[16].mxu0 %vm397_vm9, %v1255_v45 }
 0x136   : > { %v1039_v29 = vpop.permute.xlu0 %1038 }
 0x180   : > { %v442_v49 = vpop.f32.mrb[0].mxu0 }
 0x181   : > { %v444_v50 = vpop.f32.mrb[1].mxu0  ;;  %v493_v51 = vadd.f32 %v492_v1, %v442_v49 }
 0x182   : > { %v446_v52 = vpop.f32.mrb[2].mxu0  ;;  %v495_v53 = vadd.f32 %v494_v46, %v444_v50 }
 0x183   : > { %v447_v54 = vpop.f32.mrb[3].mxu0 }
 0x1e6   : > { %v588_v55 = vpop.f32.mrb[4].mxu0 }
 0x1e7   : > { %v595_v56 = vadd.f32 %v588_v55, %v493_v51  ;;  %v590_v57 = vpop.f32.mrb[5].mxu0 }
 0x1e8   : > { %v596_v58 = vadd.f32 %v590_v57, %v495_v53  ;;  %v592_v59 = vpop.f32.mrb[6].mxu0 }
 0x1e9   : > { %v593_v60 = vpop.f32.mrb[7].mxu0 }
 0x1ed   : > { %v666_v61 = vpop.f32.mrb[4].mxu1 }
 0x1ee   : > { %v673_v62 = vadd.f32 %v666_v61, %v595_v56  ;;  %v668_v63 = vpop.f32.mrb[5].mxu1  ;;  %v729_v0 = vpop.f32.mrb[8].mxu0 }
 0x1ef   : > { %v674_v2 = vadd.f32 %v668_v63, %v596_v58  ;;  %v731_v3 = vpop.f32.mrb[9].mxu0  ;;  %v670_v4 = vpop.f32.mrb[6].mxu1 }
 0x1f0   : > { %v736_v5 = vadd.f32 %v729_v0, %v673_v62  ;;  %v671_v6 = vpop.f32.mrb[7].mxu1  ;;  %v733_v7 = vpop.f32.mrb[10].mxu0 }
 0x1f1   : > { %v737_v8 = vadd.f32 %v731_v3, %v674_v2  ;;  %v734_v9 = vpop.f32.mrb[11].mxu0 }
 0x1f5   : > { %v807_v10 = vpop.f32.mrb[8].mxu1 }
 0x1f6   : > { %v814_v11 = vadd.f32 %v807_v10, %v736_v5  ;;  %v809_v12 = vpop.f32.mrb[9].mxu1  ;;  %v885_v13 = vpop.f32.mrb[12].mxu0 }
 0x1f7   : > { %v815_v14 = vadd.f32 %v809_v12, %v737_v8  ;;  %v887_v15 = vpop.f32.mrb[13].mxu0  ;;  %v811_v16 = vpop.f32.mrb[10].mxu1 }
 0x1f8   : > { %v892_v17 = vadd.f32 %v885_v13, %v814_v11  ;;  %v812_v18 = vpop.f32.mrb[11].mxu1  ;;  %v889_v19 = vpop.f32.mrb[14].mxu0 }
 0x1f9   : > { %v893_v20 = vadd.f32 %v887_v15, %v815_v14  ;;  %v890_v21 = vpop.f32.mrb[15].mxu0 }
 0x1fd   : > { %v948_v22 = vpop.f32.mrb[12].mxu1 }
 0x1fe   : > { %v955_v23 = vadd.f32 %v948_v22, %v892_v17  ;;  %v950_v24 = vpop.f32.mrb[13].mxu1 }
 0x1ff   : > { %v956_v25 = vadd.f32 %v950_v24, %v893_v20  ;;  %v952_v26 = vpop.f32.mrb[14].mxu1 }
 0x200   : > { %v953_v27 = vpop.f32.mrb[15].mxu1 }
 0x201   : > { %v1026_v28 = vpop.f32.mrb[16].mxu0 }
 0x202   : > { %v1033_v30 = vadd.f32 %v1026_v28, %v955_v23  ;;  %v1028_v31 = vpop.f32.mrb[17].mxu0 }
 0x203   : > { %v1034_v32 = vadd.f32 %v1028_v31, %v956_v25  ;;  %v1030_v33 = vpop.f32.mrb[18].mxu0 }
 0x204   : > { %v1041_v34 = vadd.f32 %v1039_v29, %v1033_v30  ;;  %v1031_v35 = vpop.f32.mrb[19].mxu0 }
 0x205   : > { %v1042_v36 = vadd.f32 %v1039_v29, %v1034_v32 }
 0x206   : > { %vm1043_vm8 = vcmp.ge.f32.partialorder %v1041_v34, 0.0  ;;  %v1045_v37 = vmul.f32 0.01, %v1041_v34  ;;  %1051 = vst [vmem:[%s288_s7] sm:$0xff] %v1041_v34 }
 0x207   : > { %vm1044_vm9 = vcmp.ge.f32.partialorder %v1042_v36, 0.0  ;;  %v1046_v38 = vmul.f32 0.01, %v1042_v36  ;;  %1052 = vst [vmem:[%s288_s7 + $0x8] sm:$0xff] %v1042_v36 }
 0x208   : > { %v1047_v39 = vsel %vm1043_vm8, %v1041_v34, %v1045_v37 }
 0x209   : > { %1360 = shalt.err (!%p1357_p5)
}
 0x20a   : > { %s1361_s29 = scalar_lea.hbm %s1690_s13, 256  ;;  %s1365_s21 = scalar_lea.hbm %s1775_s5, 512 }
 0x20b   : > { %p1362_p6 = scmp.ne.s32.totalorder %s1690_s13, %s1361_s29  ;;  %p1366_p10 = scmp.lt.u32.totalorder %s1690_s13, %s1775_s5 }
 0x20c   : > { %p1367_p11 = scmp.lt.u32.totalorder %s1365_s21, %s1361_s29  ;;  %p1369_p13 = scmp.lt.u32.totalorder %s1361_s29, %s1690_s13 }
 0x20d   : > { %p1363_p7 = pnand %p1362_p6, %p1545_p4 }
 0x20e   : > { %p1368_p12 = por %p1367_p11, %p1366_p10 }
 0x20f   : > { %p1364_p9 = pneg %p1363_p7 }
 0x210   : > { %p1370_p0 = por %p1369_p13, %p1368_p12 }
 0x212   : > { %p1371_p1 = pnand %p1370_p0, %p1364_p9 }
 0x214   : > { %1374 = shalt.err (!%p1371_p1)
}
 0x215   : > { %1273 = dma.vmem_to_hbm [thread:$0]  (%p1545_p4), %s1692_s8, 256, %s1690_s13, %s1059_s16   ;;  %v1048_v40 = vsel %vm1044_vm9, %v1042_v36, %v1046_v38  ;;  %1049 = vst [vmem:[%s1684_s9] sm:$0xff] %v1047_v39 }
 0x216   : > { %1050 = vst [vmem:[%s1684_s9 + $0x8] sm:$0xff] %v1048_v40  ;;  %s1054_s17 = scalar_lea.sflag [#allocation3], %s1680_s25  ;;  %s1375_s27 = scalar_lea.vmem %s1699_s10, 256 }
 0x217   : > { %p1376_p2 = scmp.ne.s32.totalorder %s1699_s10, %s1375_s27  ;;  %s1474_s11 = smov [#allocation2]  }
 0x218   : > { %s1379_s29 = sshll.u32 %s1474_s11, 4  ;;  %s1380_s29 = int_to_ptr.vmem [resolvable:$false] %s1379_s29 }
 0x219   : > { %p1377_p3 = pnand %p1376_p2, %p1545_p4  ;;  %s1381_s7 = scalar_lea.vmem %s1380_s29, 512 }
 0x21a   : > { %p1382_p6 = scmp.lt.s32.totalorder %s1699_s10, %s1380_s29  ;;  %p1383_p7 = scmp.lt.s32.totalorder %s1381_s7, %s1375_s27 }
 0x21b   : > { %p1378_p5 = pneg %p1377_p3 }
 0x21c   : > { %p1384_p9 = por %p1383_p7, %p1382_p6 }
 0x21e   : > { %p1385_p10 = pnand %p1384_p9, %p1378_p5 }
 0x220   : > { %1388 = shalt.err (!%p1385_p10)
}
 0x221   : > { %s1389_s25 = scalar_lea.hbm %s1697_s15, 256  ;;  %s1393_s13 = scalar_lea.hbm %s1774_s4, 512 }
 0x222   : > { %p1390_p11 = scmp.ne.s32.totalorder %s1697_s15, %s1389_s25  ;;  %p1394_p0 = scmp.lt.u32.totalorder %s1697_s15, %s1774_s4 }
 0x223   : > { %p1395_p1 = scmp.lt.u32.totalorder %s1393_s13, %s1389_s25  ;;  %p1397_p3 = scmp.lt.u32.totalorder %s1389_s25, %s1697_s15 }
 0x224   : > { %p1391_p12 = pnand %p1390_p11, %p1545_p4 }
 0x225   : > { %p1396_p2 = por %p1395_p1, %p1394_p0 }
 0x226   : > { %p1392_p13 = pneg %p1391_p12 }
 0x227   : > { %p1398_p5 = por %p1397_p3, %p1396_p2 }
 0x229   : > { %p1399_p6 = pnand %p1398_p5, %p1392_p13 }
 0x22b   : > { %1402 = shalt.err (!%p1399_p6)
}
 0x22c   : > { %1272 = dma.vmem_to_hbm [thread:$0]  (%p1545_p4), %s1699_s10, 256, %s1697_s15, %s1054_s17  }
 0x22d PF: > { %p1283_p7 = scmp.ge.s32.totalorder %s1457_s23, 2  ;;  %s1103_s21 = sand.u32 1, %s1437_s18  }
 0x22e   : > { %s1104_s14 = scalar_lea.sflag [#allocation3], %s1103_s21 }
 0x22f   : > { %p1277_p9 = pnand %p1283_p7, %p1552_p8 }
 0x231   : > { %1428 = dma.done.wait (!%p1277_p9), %s1104_s14, 256  }
 0x232   : > { %1430 = vsyncadd (!%p1277_p9), %s1104_s14, 4294967040  ;;  %s1113_s24 = scalar_lea.sflag [#allocation5], %s1103_s21 }
 0x233   : > { %1432 = dma.done.wait (!%p1277_p9), %s1113_s24, 256  }
 0x234   : > { %1434 = vsyncadd (!%p1277_p9), %s1113_s24, 4294967040  ;;  %s22_s23 = sadd.s32 1, %s1457_s23   ;;  %s1778_s18 = smov %s1441_s19 }
 0x235   : > { %p19_p10 = scmp.ge.s32.totalorder %s22_s23, 4   ;;  %s1779_s19 = smov %s1445_s20 }
 0x236   : > { %s1780_s20 = smov %s1558_s6  ;;  %s1781_s21 = smov %s1453_s22 }
 0x237   : > { %s1782_s22 = smov %s1784_s26  ;;  %21 = sbr.rel (!%p19_p10) target bundleno = 6 (0x6), region = 99 }
 0x23e   :  { %1118 = vsyncpa [#allocation3], 1 }
 0x23f   :  { %1120 = vsyncpa [#allocation3 + $0x1], 1 }
 0x240   :  { %1121 = vsyncpa [#allocation5], 1 }
 0x241   :  { %1123 = vsyncpa [#allocation5 + $0x1], 1 }

// kernel: tpu_custom_call.1
= control target key start
LH: loop header
LB: loop body
LE: loop exit
PB: predicated region body
PF: predicated region fallthrough
CT: control target
= control target key end

     0   :  { %11 = vsyncpa [#allocation3], 0  ;;  %s1770_s0 = inlined_call_operand.vmem [shape: bf16[2,4,512], index: 0, kind: input, shape index: {}]   ;;  %s1771_s1 = inlined_call_operand.vmem [shape: bf16[2,4,512], index: 1, kind: input, shape index: {}]   ;;  %s1772_s2 = inlined_call_operand.vmem [shape: bf16[9,8,4], index: 2, kind: input, shape index: {}]   ;;  %s1773_s3 = inlined_call_operand.vmem [shape: f32[8,1], index: 3, kind: input, shape index: {}]   ;;  %s1774_s4 = inlined_call_operand.hbm [shape: f32[2,8,256], index: 4, kind: output, shape index: {0}]   ;;  %s1775_s5 = inlined_call_operand.hbm [shape: f32[2,8,256], index: 5, kind: output, shape index: {1}]  }
   0x1   :  { %13 = vsyncpa [#allocation3 + $0x1], 0 }
   0x2   :  { %14 = vsyncpa [#allocation5], 0 }
   0x3   :  { %16 = vsyncpa [#allocation5 + $0x1], 0  ;;  %s1505_s18 = smov 0   ;;  %s1507_s19 = smov 0  }
   0x4   :  { %s1509_s20 = smov 0   ;;  %s1511_s21 = smov 0  }
   0x5   :  { %s1513_s22 = smov 0   ;;  %s1515_s23 = smov 0  }
   0x6 LB: > { %s1220_s24 = sadd.s32 4294967295, %s1457_s23   ;;  %s1221_s25 = sadd.s32 4294967294, %s1457_s23   ;;  %s1457_s23 = sphi %s1515_s23, %s22_s23   ;;  %s1453_s22 = sphi %s1513_s22, %s1782_s22   ;;  %s1449_s21 = sphi %s1511_s21, %s1781_s21   ;;  %s1445_s20 = sphi %s1509_s20, %s1780_s20   ;;  %s1441_s19 = sphi %s1507_s19, %s1779_s19   ;;  %s1437_s18 = sphi %s1505_s18, %s1778_s18  }
   0x7   : > { %s34_s26 = sadd.s32 1, %s1453_s22  ;;  %s145_s27 = sadd.s32 1, %s1445_s20 }
   0x8   : > { %p36_p0 = scmp.ge.s32.totalorder %s34_s26, 2  ;;  %p155_p1 = scmp.ne.s32.totalorder %s1445_s20, %s1441_s19 }
   0x9   : > { %p156_p2 = scmp.eq.s32.totalorder %s1220_s24, 1  ;;  %p161_p3 = scmp.ne.s32.totalorder %s1441_s19, %s1437_s18 }
   0xa   : > { %s1784_s26 = smov (%p36_p0, %s34_s26), 0  ;;  %p162_p5 = scmp.eq.s32.totalorder %s1221_s25, 1 }
   0xb   : > { %p1545_p4 = por %p156_p2, %p155_p1  ;;  %s140_s29 = ssub.s32 %s1453_s22, %s1784_s26 }
   0xc   : > { %p1224_p6 = scmp.ge.s32.totalorder %s1457_s23, 1  ;;  %p143_p7 = scmp.eq.s32.totalorder %s140_s29, 0 }
   0xd   : > { %p1552_p8 = por %p162_p5, %p161_p3  ;;  %p242_p9 = scmp.lt.s32.totalorder %s1457_s23, 3 }
   0xe   : > { %s1558_s6 = scalar_select %p143_p7, %s1445_s20, %s145_s27  }
   0xf   : > { %p243_p10 = pnand %p1224_p6, %p242_p9 }
  0x10   : > { %v330_v0 = vlaneseq (!%p243_p10)  ;;  %v1459_v1 = vmov (!%p243_p10), 0   ;;  %s1460_s7 = smov (!%p243_p10), 2   ;;  %p290_p11 = scmp.lt.s32.totalorder (!%p243_p10), %s1449_s21, 1  ;;  %vm401_vm8 = vcmask (!%p243_p10), 1041408   ;;  %vm397_vm9 = vcmask (!%p243_p10), 31744   ;;  %v1035_v59 = vld [vmem:[%s1773_s3] sm:$0xff] (!%p243_p10) }
  0x11   : > { %246 = sbr.rel (%p243_p10) target bundleno = 557 (0x22d), region = 36  ;;  %440 = vmatprep.mubr.bf16.mxu0 (!%p243_p10), %v1459_v1  ;;  %490 = vmatprep.mubr.bf16.mxu1 (!%p243_p10), %v1459_v1  ;;  %s1461_s8 = smov (!%p243_p10), 16   ;;  %v384_v21 = vld [vmem:[%s1772_s2] sm:$0xf] (!%p243_p10)  ;;  %vm523_vm12 = vcmask (!%p243_p10), 15360  }
  0x12   : > { %v331_v2 = vand.u32 (!%p243_p10), 127, %v330_v0  ;;  %1346 = vset.pattern.permute.xlu0 (!%p243_p10), %v1459_v1  ;;  %v373_v3 = vshrl.u32 (!%p243_p10), %v330_v0, 7  ;;  %s1462_s10 = smov (!%p243_p10), 18   ;;  %s1463_s15 = smov (!%p243_p10), 32   ;;  %v1232_v55 = vld [vmem:[%s1772_s2 + $0x4] sm:$0xf] (!%p243_p10) }
  0x13   : > { %s1464_s17 = smov (!%p243_p10), 34   ;;  %s1465_s29 = smov (!%p243_p10), 127  }
  0x14   : > { %v332_v4 = vadd.s32 (!%p243_p10), 128, %v331_v2  ;;  %v340_v5 = vand.u32 (!%p243_p10), 15, %v331_v2  ;;  %v374_v7 = vsub.s32 (!%p243_p10), 0, %v373_v3  ;;  %v378_v8 = vsub.s32 (!%p243_p10), 4, %v373_v3  ;;  %s1469_s12 = smov (!%p243_p10), 96   ;;  %s1470_s13 = smov (!%p243_p10), 110  }
  0x15   : > { %s1680_s25 = sand.u32 (!%p243_p10), 1, %s1441_s19   ;;  %s1473_s24 = smov (!%p243_p10), [#allocation4]  }
  0x16   : > { %v347_v6 = vand.u32 (!%p243_p10), 15, %v332_v4  ;;  %vm501_vm0 = vcmp.lt.s32.totalorder (!%p243_p10), %v340_v5, 15  ;;  %vm360_vm1 = vcmp.ge.s32.totalorder (!%p243_p10), %v340_v5, 1 }
  0x18   : > { %vm502_vm2 = vcmp.lt.s32.totalorder %v347_v6, 15  ;;  %vm361_vm3 = vcmp.ge.s32.totalorder %v347_v6, 1  ;;  %s291_s9 = scalar_select %p290_p11, %s1449_s21, 1 }
  0x19   : > { %vm509_vm4 = vmpackc.low %vm502_vm2, %vm501_vm0  ;;  %vm601_vm0 = vcmask 130048  }
  0x1a   : > { %v510_v9 = vsel %vm509_vm4, 65537, %v1459_v1  ;;  %vm370_vm5 = vmpackc.low %vm361_vm3, %vm360_vm1  ;;  %s1266_s11 = sshll.u32 %s291_s9, 3 }
  0x1b   : > { %v514_v10 = vrot.slane %v510_v9, %v374_v7  ;;  %v371_v11 = vsel %vm370_vm5, 65537, %v1459_v1  ;;  %v518_v13 = vrot.slane %v510_v9, %v378_v8  ;;  %s297_s14 = scalar_lea.vmem %s1770_s0, %s1266_s11  ;;  %s1268_s16 = sadd.s32 4, %s1266_s11  ;;  %vm742_vm5 = vcmask 146432  }
  0x1c   : > { %v375_v12 = vrot.slane %v371_v11, %v374_v7  ;;  %v379_v14 = vrot.slane %v371_v11, %v378_v8  ;;  %v1570_v15 = vld.sshfl [vmem:[%s297_s14] sm:$0x33 pattern:$0x76325410]  ;;  %s308_s27 = scalar_lea.vmem %s1771_s1, %s1268_s16  ;;  %s1468_s11 = smov 112  }
  0x1d   : > { %519 = vrot.lane.b32.xlu0 %v514_v10, %s1460_s7  ;;  %v1574_v16 = vcombine.high %v1570_v15, %v1570_v15  ;;  %v1581_v17 = vld [vmem:[%s308_s27] sm:$0x3]  ;;  %s1471_s14 = smov 95   ;;  %v1237_v11 = vld [vmem:[%s1772_s2 + $0x8] sm:$0xf]  ;;  %s1225_s27 = sshll.u32 %s1680_s25, 4 }
  0x1e   : > { %597 = vrot.lane.b32.xlu1 %v375_v12, %s1461_s8  ;;  %vm381_vm6 = vcmp.ne.s16.totalorder %v379_v14, 0  ;;  %vm380_vm7 = vcmp.ne.s16.totalorder %v375_v12, 0  ;;  %s1684_s9 = scalar_lea.vmem [#allocation2], %s1225_s27  ;;  %s1059_s16 = scalar_lea.sflag [#allocation5], %s1680_s25 }
  0x1f   : > { %v383_v18 = vsel %vm381_vm6, %v1574_v16, 0  ;;  %v382_v19 = vsel %vm380_vm7, %v1570_v15, 0  ;;  %vm820_vm7 = vcmask 261120  }
  0x20   : > { %1235 = vmatprep.subr.msk.bf16.mxu1 %vm401_vm8, %v383_v18  ;;  %v453_v20 = vsel %vm401_vm8, %v382_v19, 0  ;;  %v1240_v19 = vld [vmem:[%s1772_s2 + $0xc] sm:$0xf] }
  0x21   : > { %521 = vrot.lane.b32.xlu0 %v518_v13, %s1460_s7  ;;  %s1466_s7 = smov 111   ;;  %459 = vmatpush1.bf16.msra.mxu1 %v453_v20 }
  0x22   : > { %599 = vrot.lane.b32.xlu1 %v379_v14, %s1461_s8 }
  0x24   : > { %1236 = vmatmul.mubr.msk.bf16.vlgmr.msra.gmra.mrb[0].mxu1 %vm397_vm9, %v384_v21  ;;  %v1243_v21 = vld [vmem:[%s1772_s2 + $0x10] sm:$0xf] }
  0x25   : > { %738 = vrot.lane.b32.xlu0 %v514_v10, %s1462_s10  ;;  %664 = vmatprep.mubr.bf16.mxu1 %v1459_v1 }
  0x26   : > { %740 = vrot.lane.b32.xlu1 %v518_v13, %s1462_s10  ;;  %s1467_s10 = smov 126  }
  0x29   : > { %816 = vrot.lane.b32.xlu0 %v375_v12, %s1463_s15 }
  0x2a   : > { %818 = vrot.lane.b32.xlu1 %v379_v14, %s1463_s15 }
  0x2d   : > { %957 = vrot.lane.b32.xlu0 %v514_v10, %s1464_s17 }
  0x2e   : > { %959 = vrot.lane.b32.xlu1 %v518_v13, %s1464_s17  ;;  %s1472_s17 = smov 94  }
  0x31   : > { %388 = vrot.lane.b32.xlu0 %v1570_v15, %s1465_s29 }
  0x32   : > { %390 = vrot.lane.b32.xlu1 %v1574_v16, %s1465_s29 }
  0x35   : > { %392 = vrot.lane.b32.xlu0 %v1581_v17, %s1465_s29  ;;  %s1269_s29 = sshll.u32 %s1449_s21, 8 }
  0x36   : > { %677 = vrot.lane.b32.xlu1 %v1570_v15, %s1466_s7  ;;  %s1697_s15 = scalar_lea.hbm %s1774_s4, %s1269_s29 }
  0x39   : > { %679 = vrot.lane.b32.xlu0 %v1574_v16, %s1466_s7 }
  0x3a   : > { %681 = vrot.lane.b32.xlu1 %v1581_v17, %s1466_s7  ;;  %s288_s7 = scalar_lea.vmem [#allocation4], %s1225_s27  ;;  %s1351_s27 = sshll.u32 %s1473_s24, 4  ;;  %s1352_s27 = int_to_ptr.vmem [resolvable:$false] %s1351_s27 }
  0x3b   : > { %s1091_s8 = sshll.u32 %s288_s7, 4  ;;  %s1692_s8 = int_to_ptr.vmem [resolvable:$true] %s1091_s8 }
  0x3c   : > { %p1354_p1 = scmp.lt.s32.totalorder %s1692_s8, %s1352_s27 }
  0x8f   : > { %v520_v22 = vpop.permute.xlu0 %519 }
  0x90   : > { %vm525_vm10 = vcmp.ne.s16.totalorder %v520_v22, 0  ;;  %v598_v23 = vpop.permute.xlu1 %597 }
  0x91   : > { %vm603_vm11 = vcmp.ne.s16.totalorder %v598_v23, 0  ;;  %v528_v24 = vsel %vm525_vm10, %v1570_v15, 0  ;;  %vm394_vm10 = vcmask 1039360  }
  0x92   : > { %v606_v25 = vsel %vm603_vm11, %v1570_v15, 0  ;;  %536 = vrot.lane.b32.xlu1 %v528_v24, %s1467_s10 }
  0x93   : > { %614 = vrot.lane.b32.xlu0 %v606_v25, %s1468_s11  ;;  %v522_v26 = vpop.permute.xlu0 %521 }
  0x94   : > { %v524_v27 = vsel %vm523_vm12, %v520_v22, %v522_v26  ;;  %vm527_vm13 = vcmp.ne.s16.totalorder %v522_v26, 0  ;;  %v600_v28 = vpop.permute.xlu1 %599 }
  0x95   : > { %vm605_vm14 = vcmp.ne.s16.totalorder %v600_v28, 0  ;;  %v530_v29 = vsel %vm527_vm13, %v1581_v17, 0  ;;  %vm526_vm15 = vcmp.ne.s16.totalorder %v524_v27, 0  ;;  %v602_v34 = vsel %vm601_vm0, %v598_v23, %v600_v28 }
  0x96   : > { %v608_v30 = vsel %vm605_vm14, %v1581_v17, 0  ;;  %540 = vrot.lane.b32.xlu1 %v530_v29, %s1467_s10  ;;  %v529_v33 = vsel %vm526_vm15, %v1574_v16, 0  ;;  %vm604_vm4 = vcmp.ne.s16.totalorder %v602_v34, 0  ;;  %vm961_vm13 = vcmask 277504  }
  0x97   : > { %618 = vrot.lane.b32.xlu0 %v608_v30, %s1468_s11  ;;  %v739_v31 = vpop.permute.xlu0 %738  ;;  %v607_v42 = vsel %vm604_vm4, %v1574_v16, 0  ;;  %vm761_vm4 = vcmask 900096  }
  0x98   : > { %v741_v32 = vpop.permute.xlu1 %740  ;;  %vm744_vm1 = vcmp.ne.s16.totalorder %v739_v31, 0 }
  0x99   : > { %vm746_vm3 = vcmp.ne.s16.totalorder %v741_v32, 0  ;;  %v747_v38 = vsel %vm744_vm1, %v1570_v15, 0  ;;  %v743_v43 = vsel %vm742_vm5, %v739_v31, %v741_v32  ;;  %vm542_vm1 = vcmask 1031168   ;;  %v1246_v31 = vld [vmem:[%s1772_s2 + $0x14] sm:$0xf] }
  0x9a   : > { %v749_v40 = vsel %vm746_vm3, %v1581_v17, 0  ;;  %vm745_vm11 = vcmp.ne.s16.totalorder %v743_v43, 0  ;;  %vm620_vm3 = vcmask 916480   ;;  %vm839_vm5 = vcmask 785408  }
  0x9b   : > { %538 = vrot.lane.b32.xlu0 %v529_v33, %s1467_s10  ;;  %v817_v35 = vpop.permute.xlu0 %816  ;;  %v748_v52 = vsel %vm745_vm11, %v1574_v16, 0  ;;  %v1249_v33 = vld [vmem:[%s1772_s2 + $0x18] sm:$0xf]  ;;  %s1075_s10 = sshll.u32 %s1684_s9, 4  ;;  %s1699_s10 = int_to_ptr.vmem [resolvable:$true] %s1075_s10 }
  0x9c   : > { %vm822_vm2 = vcmp.ne.s16.totalorder %v817_v35, 0  ;;  %v819_v36 = vpop.permute.xlu1 %818 }
  0x9d   : > { %v825_v37 = vsel %vm822_vm2, %v1570_v15, 0  ;;  %vm824_vm6 = vcmp.ne.s16.totalorder %v819_v36, 0  ;;  %v821_v46 = vsel %vm820_vm7, %v817_v35, %v819_v36  ;;  %vm683_vm2 = vcmask 908288  }
  0x9e   : > { %833 = vrot.lane.b32.xlu1 %v825_v37, %s1469_s12  ;;  %v827_v44 = vsel %vm824_vm6, %v1581_v17, 0  ;;  %vm823_vm12 = vcmp.ne.s16.totalorder %v821_v46, 0  ;;  %vm902_vm6 = vcmask 777216   ;;  %vm980_vm7 = vcmask 769024  }
  0x9f   : > { %755 = vrot.lane.b32.xlu0 %v747_v38, %s1470_s13  ;;  %v958_v39 = vpop.permute.xlu0 %957  ;;  %v826_v53 = vsel %vm823_vm12, %v1574_v16, 0 }
  0xa0   : > { %v960_v41 = vpop.permute.xlu1 %959  ;;  %vm963_vm14 = vcmp.ne.s16.totalorder %v958_v39, 0 }
  0xa1   : > { %v962_v54 = vsel %vm961_vm13, %v958_v39, %v960_v41  ;;  %v966_v56 = vsel %vm963_vm14, %v1570_v15, 0  ;;  %vm965_vm0 = vcmp.ne.s16.totalorder %v960_v41, 0  ;;  %v1252_v41 = vld [vmem:[%s1772_s2 + $0x1c] sm:$0xf] }
  0xa2   : > { %616 = vrot.lane.b32.xlu1 %v607_v42, %s1468_s11  ;;  %vm964_vm15 = vcmp.ne.s16.totalorder %v962_v54, 0  ;;  %v968_v58 = vsel %vm965_vm0, %v1581_v17, 0  ;;  %s1353_s11 = scalar_lea.vmem %s1352_s27, 512 }
  0xa3   : > { %759 = vrot.lane.b32.xlu0 %v749_v40, %s1470_s13  ;;  %v389_v45 = vpop.permute.xlu0 %388  ;;  %v967_v57 = vsel %vm964_vm15, %v1574_v16, 0 }
  0xa4   : > { %v391_v47 = vpop.permute.xlu1 %390 }
  0xa5   : > { %v395_v48 = vsel %vm394_vm10, %v389_v45, %v391_v47  ;;  %v1255_v45 = vld [vmem:[%s1772_s2 + $0x20] sm:$0xf] }
  0xa6   : > { %837 = vrot.lane.b32.xlu1 %v827_v44, %s1469_s12  ;;  %v403_v50 = vsel %vm401_vm8, %v395_v48, 0 }
  0xa7   : > { %896 = vrot.lane.b32.xlu0 %v1570_v15, %s1471_s14  ;;  %v393_v49 = vpop.permute.xlu0 %392 }
  0xa8   : > { %v396_v51 = vsel %vm394_vm10, %v391_v47, %v393_v49  ;;  %v678_v60 = vpop.permute.xlu1 %677 }
  0xa9   : > { %1233 = vmatprep.subr.msk.bf16.mxu0 %vm401_vm8, %v396_v51 }
  0xaa   : > { %757 = vrot.lane.b32.xlu1 %v748_v52, %s1470_s13  ;;  %409 = vmatpush1.bf16.msra.mxu0 %v403_v50  ;;  %s1690_s13 = scalar_lea.hbm %s1775_s5, %s1269_s29 }
  0xab   : > { %835 = vrot.lane.b32.xlu0 %v826_v53, %s1469_s12  ;;  %v680_v61 = vpop.permute.xlu0 %679 }
  0xac   : > { %v682_v62 = vpop.permute.xlu1 %681  ;;  %v684_v8 = vsel %vm683_vm2, %v678_v60, %v680_v61 }
  0xad   : > { %1234 = vmatmul.mubr.msk.bf16.vlgmr.msra.gmra.mrb[0].mxu0 %vm397_vm9, %v1232_v55  ;;  %v685_v9 = vsel %vm683_vm2, %v680_v61, %v682_v62  ;;  %v690_v13 = vsel %vm401_vm8, %v684_v8, 0 }
  0xae   : > { %898 = vrot.lane.b32.xlu1 %v1574_v16, %s1471_s14  ;;  %586 = vmatprep.mubr.bf16.mxu0 %v1459_v1 }
  0xaf   : > { %900 = vrot.lane.b32.xlu0 %v1581_v17, %s1471_s14 }
  0xb2   : > { %974 = vrot.lane.b32.xlu1 %v966_v56, %s1472_s17 }
  0xb3   : > { %976 = vrot.lane.b32.xlu0 %v967_v57, %s1472_s17 }
  0xb6   : > { %978 = vrot.lane.b32.xlu1 %v968_v58, %s1472_s17  ;;  %s1347_s17 = scalar_lea.vmem %s1692_s8, 256 }
  0xb7   : > { %1038 = vperm.xlu0 %1346, %v1035_v59   ;;  %p1348_p12 = scmp.ne.s32.totalorder %s1692_s8, %s1347_s17  ;;  %p1355_p2 = scmp.lt.s32.totalorder %s1353_s11, %s1347_s17 }
  0xb9   : > { %p1349_p13 = pnand %p1348_p12, %p1545_p4  ;;  %p1356_p3 = por %p1355_p2, %p1354_p1 }
  0xbb   : > { %p1350_p0 = pneg %p1349_p13 }
  0xbd   : > { %p1357_p5 = pnand %p1356_p3, %p1350_p0 }
 0x104   : > { %v537_v0 = vpop.permute.xlu1 %536 }
 0x105   : > { %v615_v63 = vpop.permute.xlu0 %614 }
 0x108   : > { %v541_v3 = vpop.permute.xlu1 %540 }
 0x109   : > { %v619_v2 = vpop.permute.xlu0 %618 }
 0x10d   : > { %v539_v4 = vpop.permute.xlu0 %538 }
 0x10e   : > { %v543_v5 = vsel %vm542_vm1, %v537_v0, %v539_v4  ;;  %v544_v6 = vsel %vm542_vm1, %v539_v4, %v541_v3 }
 0x10f   : > { %v549_v7 = vsel %vm401_vm8, %v543_v5, 0  ;;  %1238 = vmatprep.subr.msk.bf16.mxu0 %vm401_vm8, %v544_v6 }
 0x110   : > { %555 = vmatpush1.bf16.msra.mxu0 %v549_v7  ;;  %v834_v10 = vpop.permute.xlu1 %833 }
 0x111   : > { %1244 = vmatprep.subr.msk.bf16.mxu0 %vm401_vm8, %v685_v9  ;;  %v756_v12 = vpop.permute.xlu0 %755 }
 0x113   : > { %1239 = vmatmul.mubr.msk.bf16.vlgmr.msra.gmra.mrb[4].mxu0 %vm397_vm9, %v1237_v11 }
 0x114   : > { %696 = vmatpush1.bf16.msra.mxu0 %v690_v13  ;;  %v617_v14 = vpop.permute.xlu1 %616  ;;  %727 = vmatprep.mubr.bf16.mxu0 %v1459_v1 }
 0x115   : > { %v621_v15 = vsel %vm620_vm3, %v615_v63, %v617_v14  ;;  %v622_v16 = vsel %vm620_vm3, %v617_v14, %v619_v2  ;;  %v760_v17 = vpop.permute.xlu0 %759 }
 0x116   : > { %v627_v18 = vsel %vm401_vm8, %v621_v15, 0  ;;  %1241 = vmatprep.subr.msk.bf16.mxu1 %vm401_vm8, %v622_v16 }
 0x117   : > { %633 = vmatpush1.bf16.msra.mxu1 %v627_v18 }
 0x118   : > { %v838_v20 = vpop.permute.xlu1 %837 }
 0x119   : > { %v897_v22 = vpop.permute.xlu0 %896 }
 0x11a   : > { %1242 = vmatmul.mubr.msk.bf16.vlgmr.msra.gmra.mrb[4].mxu1 %vm397_vm9, %v1240_v19 }
 0x11b   : > { %1245 = vmatmul.mubr.msk.bf16.vlgmr.msra.gmra.mrb[8].mxu0 %vm397_vm9, %v1243_v21  ;;  %805 = vmatprep.mubr.bf16.mxu1 %v1459_v1 }
 0x11c   : > { %v758_v23 = vpop.permute.xlu1 %757  ;;  %883 = vmatprep.mubr.bf16.mxu0 %v1459_v1 }
 0x11d   : > { %v762_v24 = vsel %vm761_vm4, %v756_v12, %v758_v23  ;;  %v763_v25 = vsel %vm761_vm4, %v758_v23, %v760_v17  ;;  %v836_v26 = vpop.permute.xlu0 %835 }
 0x11e   : > { %v768_v27 = vsel %vm401_vm8, %v762_v24, 0  ;;  %v840_v28 = vsel %vm839_vm5, %v834_v10, %v836_v26  ;;  %v841_v29 = vsel %vm839_vm5, %v836_v26, %v838_v20  ;;  %1247 = vmatprep.subr.msk.bf16.mxu1 %vm401_vm8, %v763_v25 }
 0x11f   : > { %v846_v30 = vsel %vm401_vm8, %v840_v28, 0  ;;  %1250 = vmatprep.subr.msk.bf16.mxu0 %vm401_vm8, %v841_v29  ;;  %774 = vmatpush1.bf16.msra.mxu1 %v768_v27 }
 0x120   : > { %852 = vmatpush1.bf16.msra.mxu0 %v846_v30  ;;  %v899_v32 = vpop.permute.xlu1 %898 }
 0x121   : > { %v903_v34 = vsel %vm902_vm6, %v897_v22, %v899_v32  ;;  %v901_v35 = vpop.permute.xlu0 %900 }
 0x122   : > { %v909_v36 = vsel %vm401_vm8, %v903_v34, 0  ;;  %v904_v37 = vsel %vm902_vm6, %v899_v32, %v901_v35  ;;  %1248 = vmatmul.mubr.msk.bf16.vlgmr.msra.gmra.mrb[8].mxu1 %vm397_vm9, %v1246_v31 }
 0x123   : > { %1253 = vmatprep.subr.msk.bf16.mxu1 %vm401_vm8, %v904_v37  ;;  %1251 = vmatmul.mubr.msk.bf16.vlgmr.msra.gmra.mrb[12].mxu0 %vm397_vm9, %v1249_v33 }
 0x124   : > { %915 = vmatpush1.bf16.msra.mxu1 %v909_v36  ;;  %v975_v38 = vpop.permute.xlu1 %974  ;;  %946 = vmatprep.mubr.bf16.mxu1 %v1459_v1 }
 0x125   : > { %v977_v39 = vpop.permute.xlu0 %976  ;;  %1024 = vmatprep.mubr.bf16.mxu0 %v1459_v1  ;;  %v492_v1 = vpop.f32.mrb[0].mxu1 }
 0x126   : > { %v981_v40 = vsel %vm980_vm7, %v975_v38, %v977_v39  ;;  %v494_v46 = vpop.f32.mrb[1].mxu1 }
 0x127   : > { %v987_v44 = vsel %vm401_vm8, %v981_v40, 0  ;;  %v496_v47 = vpop.f32.mrb[2].mxu1 }
 0x128   : > { %v979_v42 = vpop.permute.xlu1 %978  ;;  %v497_v48 = vpop.f32.mrb[3].mxu1 }
 0x129   : > { %v982_v43 = vsel %vm980_vm7, %v977_v39, %v979_v42 }
 0x12a   : > { %1254 = vmatmul.mubr.msk.bf16.vlgmr.msra.gmra.mrb[12].mxu1 %vm397_vm9, %v1252_v41  ;;  %1256 = vmatprep.subr.msk.bf16.mxu0 %vm401_vm8, %v982_v43 }
 0x12b   : > { %993 = vmatpush1.bf16.msra.mxu0 %v987_v44 }
 0x12e   : > { %1257 = vmatmul.mubr.msk.bf16.vlgmr.msra.gmra.mrb[16].mxu0 %vm397_vm9, %v1255_v45 }
 0x136   : > { %v1039_v29 = vpop.permute.xlu0 %1038 }
 0x180   : > { %v442_v49 = vpop.f32.mrb[0].mxu0 }
 0x181   : > { %v444_v50 = vpop.f32.mrb[1].mxu0  ;;  %v493_v51 = vadd.f32 %v492_v1, %v442_v49 }
 0x182   : > { %v446_v52 = vpop.f32.mrb[2].mxu0  ;;  %v495_v53 = vadd.f32 %v494_v46, %v444_v50 }
 0x183   : > { %v447_v54 = vpop.f32.mrb[3].mxu0 }
 0x1e6   : > { %v588_v55 = vpop.f32.mrb[4].mxu0 }
 0x1e7   : > { %v595_v56 = vadd.f32 %v588_v55, %v493_v51  ;;  %v590_v57 = vpop.f32.mrb[5].mxu0 }
 0x1e8   : > { %v596_v58 = vadd.f32 %v590_v57, %v495_v53  ;;  %v592_v59 = vpop.f32.mrb[6].mxu0 }
 0x1e9   : > { %v593_v60 = vpop.f32.mrb[7].mxu0 }
 0x1ed   : > { %v666_v61 = vpop.f32.mrb[4].mxu1 }
 0x1ee   : > { %v673_v62 = vadd.f32 %v666_v61, %v595_v56  ;;  %v668_v63 = vpop.f32.mrb[5].mxu1  ;;  %v729_v0 = vpop.f32.mrb[8].mxu0 }
 0x1ef   : > { %v674_v2 = vadd.f32 %v668_v63, %v596_v58  ;;  %v731_v3 = vpop.f32.mrb[9].mxu0  ;;  %v670_v4 = vpop.f32.mrb[6].mxu1 }
 0x1f0   : > { %v736_v5 = vadd.f32 %v729_v0, %v673_v62  ;;  %v671_v6 = vpop.f32.mrb[7].mxu1  ;;  %v733_v7 = vpop.f32.mrb[10].mxu0 }
 0x1f1   : > { %v737_v8 = vadd.f32 %v731_v3, %v674_v2  ;;  %v734_v9 = vpop.f32.mrb[11].mxu0 }
 0x1f5   : > { %v807_v10 = vpop.f32.mrb[8].mxu1 }
 0x1f6   : > { %v814_v11 = vadd.f32 %v807_v10, %v736_v5  ;;  %v809_v12 = vpop.f32.mrb[9].mxu1  ;;  %v885_v13 = vpop.f32.mrb[12].mxu0 }
 0x1f7   : > { %v815_v14 = vadd.f32 %v809_v12, %v737_v8  ;;  %v887_v15 = vpop.f32.mrb[13].mxu0  ;;  %v811_v16 = vpop.f32.mrb[10].mxu1 }
 0x1f8   : > { %v892_v17 = vadd.f32 %v885_v13, %v814_v11  ;;  %v812_v18 = vpop.f32.mrb[11].mxu1  ;;  %v889_v19 = vpop.f32.mrb[14].mxu0 }
 0x1f9   : > { %v893_v20 = vadd.f32 %v887_v15, %v815_v14  ;;  %v890_v21 = vpop.f32.mrb[15].mxu0 }
 0x1fd   : > { %v948_v22 = vpop.f32.mrb[12].mxu1 }
 0x1fe   : > { %v955_v23 = vadd.f32 %v948_v22, %v892_v17  ;;  %v950_v24 = vpop.f32.mrb[13].mxu1 }
 0x1ff   : > { %v956_v25 = vadd.f32 %v950_v24, %v893_v20  ;;  %v952_v26 = vpop.f32.mrb[14].mxu1 }
 0x200   : > { %v953_v27 = vpop.f32.mrb[15].mxu1 }
 0x201   : > { %v1026_v28 = vpop.f32.mrb[16].mxu0 }
 0x202   : > { %v1033_v30 = vadd.f32 %v1026_v28, %v955_v23  ;;  %v1028_v31 = vpop.f32.mrb[17].mxu0 }
 0x203   : > { %v1034_v32 = vadd.f32 %v1028_v31, %v956_v25  ;;  %v1030_v33 = vpop.f32.mrb[18].mxu0 }
 0x204   : > { %v1041_v34 = vadd.f32 %v1039_v29, %v1033_v30  ;;  %v1031_v35 = vpop.f32.mrb[19].mxu0 }
 0x205   : > { %v1042_v36 = vadd.f32 %v1039_v29, %v1034_v32 }
 0x206   : > { %vm1043_vm8 = vcmp.ge.f32.partialorder %v1041_v34, 0.0  ;;  %v1045_v37 = vmul.f32 0.01, %v1041_v34  ;;  %1051 = vst [vmem:[%s288_s7] sm:$0xff] %v1041_v34 }
 0x207   : > { %vm1044_vm9 = vcmp.ge.f32.partialorder %v1042_v36, 0.0  ;;  %v1046_v38 = vmul.f32 0.01, %v1042_v36  ;;  %1052 = vst [vmem:[%s288_s7 + $0x8] sm:$0xff] %v1042_v36 }
 0x208   : > { %v1047_v39 = vsel %vm1043_vm8, %v1041_v34, %v1045_v37 }
 0x209   : > { %1360 = shalt.err (!%p1357_p5)
}
 0x20a   : > { %s1361_s29 = scalar_lea.hbm %s1690_s13, 256  ;;  %s1365_s21 = scalar_lea.hbm %s1775_s5, 512 }
 0x20b   : > { %p1362_p6 = scmp.ne.s32.totalorder %s1690_s13, %s1361_s29  ;;  %p1366_p10 = scmp.lt.u32.totalorder %s1690_s13, %s1775_s5 }
 0x20c   : > { %p1367_p11 = scmp.lt.u32.totalorder %s1365_s21, %s1361_s29  ;;  %p1369_p13 = scmp.lt.u32.totalorder %s1361_s29, %s1690_s13 }
 0x20d   : > { %p1363_p7 = pnand %p1362_p6, %p1545_p4 }
 0x20e   : > { %p1368_p12 = por %p1367_p11, %p1366_p10 }
 0x20f   : > { %p1364_p9 = pneg %p1363_p7 }
 0x210   : > { %p1370_p0 = por %p1369_p13, %p1368_p12 }
 0x212   : > { %p1371_p1 = pnand %p1370_p0, %p1364_p9 }
 0x214   : > { %1374 = shalt.err (!%p1371_p1)
}
 0x215   : > { %1273 = dma.vmem_to_hbm [thread:$0]  (%p1545_p4), %s1692_s8, 256, %s1690_s13, %s1059_s16   ;;  %v1048_v40 = vsel %vm1044_vm9, %v1042_v36, %v1046_v38  ;;  %1049 = vst [vmem:[%s1684_s9] sm:$0xff] %v1047_v39 }
 0x216   : > { %1050 = vst [vmem:[%s1684_s9 + $0x8] sm:$0xff] %v1048_v40  ;;  %s1054_s17 = scalar_lea.sflag [#allocation3], %s1680_s25  ;;  %s1375_s27 = scalar_lea.vmem %s1699_s10, 256 }
 0x217   : > { %p1376_p2 = scmp.ne.s32.totalorder %s1699_s10, %s1375_s27  ;;  %s1474_s11 = smov [#allocation2]  }
 0x218   : > { %s1379_s29 = sshll.u32 %s1474_s11, 4  ;;  %s1380_s29 = int_to_ptr.vmem [resolvable:$false] %s1379_s29 }
 0x219   : > { %p1377_p3 = pnand %p1376_p2, %p1545_p4  ;;  %s1381_s7 = scalar_lea.vmem %s1380_s29, 512 }
 0x21a   : > { %p1382_p6 = scmp.lt.s32.totalorder %s1699_s10, %s1380_s29  ;;  %p1383_p7 = scmp.lt.s32.totalorder %s1381_s7, %s1375_s27 }
 0x21b   : > { %p1378_p5 = pneg %p1377_p3 }
 0x21c   : > { %p1384_p9 = por %p1383_p7, %p1382_p6 }
 0x21e   : > { %p1385_p10 = pnand %p1384_p9, %p1378_p5 }
 0x220   : > { %1388 = shalt.err (!%p1385_p10)
}
 0x221   : > { %s1389_s25 = scalar_lea.hbm %s1697_s15, 256  ;;  %s1393_s13 = scalar_lea.hbm %s1774_s4, 512 }
 0x222   : > { %p1390_p11 = scmp.ne.s32.totalorder %s1697_s15, %s1389_s25  ;;  %p1394_p0 = scmp.lt.u32.totalorder %s1697_s15, %s1774_s4 }
 0x223   : > { %p1395_p1 = scmp.lt.u32.totalorder %s1393_s13, %s1389_s25  ;;  %p1397_p3 = scmp.lt.u32.totalorder %s1389_s25, %s1697_s15 }
 0x224   : > { %p1391_p12 = pnand %p1390_p11, %p1545_p4 }
 0x225   : > { %p1396_p2 = por %p1395_p1, %p1394_p0 }
 0x226   : > { %p1392_p13 = pneg %p1391_p12 }
 0x227   : > { %p1398_p5 = por %p1397_p3, %p1396_p2 }
 0x229   : > { %p1399_p6 = pnand %p1398_p5, %p1392_p13 }
 0x22b   : > { %1402 = shalt.err (!%p1399_p6)
}
 0x22c   : > { %1272 = dma.vmem_to_hbm [thread:$0]  (%p1545_p4), %s1699_s10, 256, %s1697_s15, %s1054_s17  }
 0x22d PF: > { %p1283_p7 = scmp.ge.s32.totalorder %s1457_s23, 2  ;;  %s1103_s21 = sand.u32 1, %s1437_s18  }
 0x22e   : > { %s1104_s14 = scalar_lea.sflag [#allocation3], %s1103_s21 }
 0x22f   : > { %p1277_p9 = pnand %p1283_p7, %p1552_p8 }
 0x231   : > { %1428 = dma.done.wait (!%p1277_p9), %s1104_s14, 256  }
 0x232   : > { %1430 = vsyncadd (!%p1277_p9), %s1104_s14, 4294967040  ;;  %s1113_s24 = scalar_lea.sflag [#allocation5], %s1103_s21 }
 0x233   : > { %1432 = dma.done.wait (!%p1277_p9), %s1113_s24, 256  }
 0x234   : > { %1434 = vsyncadd (!%p1277_p9), %s1113_s24, 4294967040  ;;  %s22_s23 = sadd.s32 1, %s1457_s23   ;;  %s1778_s18 = smov %s1441_s19 }
 0x235   : > { %p19_p10 = scmp.ge.s32.totalorder %s22_s23, 4   ;;  %s1779_s19 = smov %s1445_s20 }
 0x236   : > { %s1780_s20 = smov %s1558_s6  ;;  %s1781_s21 = smov %s1453_s22 }
 0x237   : > { %s1782_s22 = smov %s1784_s26  ;;  %21 = sbr.rel (!%p19_p10) target bundleno = 6 (0x6), region = 99 }
 0x23e   :  { %1118 = vsyncpa [#allocation3], 1 }
 0x23f   :  { %1120 = vsyncpa [#allocation3 + $0x1], 1 }
 0x240   :  { %1121 = vsyncpa [#allocation5], 1 }
 0x241   :  { %1123 = vsyncpa [#allocation5 + $0x1], 1 }

</bundles_post_ra>
